<compile_context>
chip_gen: v7x
topology: tpu7x:2x2x1
jax: 0.10.0
libtpu: 0.0.40
codegen_flags: <defaults>
</compile_context>

<pallas_src>
import functools
import math

import jax
import jax.numpy as jnp
from jax import lax
from jax.experimental import pallas as pl
from jax.experimental.pallas import tpu as pltpu


# ----------------------------------------------------------------------------
# Fused bidirectional-GRU kernel (one grid step per batch BLOCK of Bblk rows)
# ----------------------------------------------------------------------------
def _bigru_kernel(len_sm_ref,            # SMEM (Bp,) int32   [scalar prefetch]
                  lens_ref,              # (Bblk, 1) int32    (VMEM copy)
                  x_ref,                 # (S, Bblk, D) f32   time-major input
                  wih_ref,               # (D, 6H) bf16  cols [f_r|f_z|f_n|b_r|b_z|b_n]
                  bih_ref,               # (1, 6H) f32
                  whh_ref,               # (6, H, H) f32  per-(dir,gate), pre-transposed
                  bhh_ref,               # (6, 1, H) f32
                  seq_ref,               # out (S, Bblk, 2H) f32
                  glob_ref,              # out (Bblk, 2H) f32
                  gi_scr,                # scratch (6, S, Bblk, H) f32 gate-major
                  *, S, D, H, Bblk, eps):
    blk = pl.program_id(0)
    base = blk * Bblk

    # Max valid length in this block (scalar, SMEM) -> dynamic trip count so
    # padded timesteps beyond the block max are skipped entirely.
    t_max = len_sm_ref[base]
    for i in range(1, Bblk):
        t_max = jnp.maximum(t_max, len_sm_ref[base + i])

    lens = lens_ref[...]                                    # (Bblk, 1) int32

    # Pre-zero the resident output block once: timesteps >= t_max are never
    # written by the loop -> exact pad_packed_sequence zeros.
    seq_ref[...] = jnp.zeros_like(seq_ref)

    # ---- fused input projection: all timesteps, both directions, one MXU op
    x2d = x_ref[...].reshape(S * Bblk, D).astype(jnp.bfloat16)
    gi = jnp.dot(x2d, wih_ref[...], preferred_element_type=jnp.float32)
    gi = gi + bih_ref[...]                                  # (S*Bblk, 6H) f32
    # Scatter to a gate-major scratch ONCE (off the serial critical path) so
    # the time loop only does leading-dim indexed loads (no lane slicing).
    for k in range(6):
        gi_scr[k] = gi[:, k * H:(k + 1) * H].reshape(S, Bblk, H)

    def cell(h, gi_r, gi_z, gi_n, gd):
        # gd: 0 = forward gates, 3 = backward gates (static python int).
        gh_r = jnp.dot(h, whh_ref[gd + 0],
                       preferred_element_type=jnp.float32) + bhh_ref[gd + 0]
        gh_z = jnp.dot(h, whh_ref[gd + 1],
                       preferred_element_type=jnp.float32) + bhh_ref[gd + 1]
        gh_n = jnp.dot(h, whh_ref[gd + 2],
                       preferred_element_type=jnp.float32) + bhh_ref[gd + 2]
        r = jax.nn.sigmoid(gi_r + gh_r)
        z = jax.nn.sigmoid(gi_z + gh_z)
        n = jnp.tanh(gi_n + r * gh_n)       # PyTorch GRU: b_hn inside r*(...)
        return (1.0 - z) * n + z * h

    def step(k, carry):
        h_f, h_b = carry                                    # (Bblk, H) f32 each
        # ---- forward direction, timestep t_f = k ---------------------------
        t_f = k
        valid_f = t_f < lens                                # (Bblk, 1) bool
        h_f_new = cell(h_f, gi_scr[0, t_f], gi_scr[1, t_f], gi_scr[2, t_f], 0)
        h_f = jnp.where(valid_f, h_f_new, h_f)              # freeze past length
        seq_ref[t_f, :, 0:H] = jnp.where(valid_f, h_f, 0.0)
        # ---- backward direction, timestep t_b = t_max-1-k (interleaved) ----
        t_b = t_max - 1 - k
        valid_b = t_b < lens
        h_b_new = cell(h_b, gi_scr[3, t_b], gi_scr[4, t_b], gi_scr[5, t_b], 3)
        h_b = jnp.where(valid_b, h_b_new, h_b)              # stays 0 while padded
        seq_ref[t_b, :, H:2 * H] = jnp.where(valid_b, h_b, 0.0)
        return h_f, h_b

    h0 = jnp.zeros((Bblk, H), jnp.float32)
    h_f, h_b = lax.fori_loop(0, t_max, step, (h0, h0))

    # ---- global vector: fwd hidden @ last valid step ++ bwd hidden @ t=0 ---
    glob = jnp.concatenate([h_f, h_b], axis=-1)             # (Bblk, 2H)
    ssq = jnp.sum(glob * glob, axis=-1, keepdims=True)
    inv = lax.rsqrt(jnp.maximum(ssq, eps))                  # EUP rsqrt
    glob_ref[...] = (glob * inv).astype(glob_ref.dtype)


# ----------------------------------------------------------------------------
# Wrapper: TextEncoderGRU.forward
# ----------------------------------------------------------------------------
def text_encoder_gru_forward(params, sentences, sentence_lengths, *, block_b=8):
    """sentences: (B, S, word_dim) f32, sentence_lengths: (B,) int (sorted desc).

    Returns (global_sentences (B, joint_dim), sentences (B, S, joint_dim),
             mask (B, S) int32 with 1 at padded positions).
    """
    B, S, D = sentences.shape
    H = params["whh"].shape[-1]          # hidden per direction = joint_dim // 2
    joint = 2 * H
    eps = 1e-12

    n_blk = pl.cdiv(B, block_b)
    Bp = n_blk * block_b
    pad = Bp - B

    lengths = sentence_lengths.astype(jnp.int32)
    lengths_p = jnp.pad(lengths, (0, pad))                  # padded rows -> len 0
    lens2d = lengths_p.reshape(Bp, 1)

    # Time-major layout (same transpose the PyTorch module performs): gives
    # contiguous per-timestep (Bblk, *) slabs inside the kernel.
    x_t = jnp.transpose(sentences, (1, 0, 2))               # (S, B, D)
    if pad:
        x_t = jnp.pad(x_t, ((0, 0), (0, pad), (0, 0)))

    grid_spec = pltpu.PrefetchScalarGridSpec(
        num_scalar_prefetch=1,                              # lengths -> SMEM
        grid=(n_blk,),
        in_specs=[
            pl.BlockSpec((block_b, 1), lambda b, lens: (b, 0)),        # lens2d
            pl.BlockSpec((S, block_b, D), lambda b, lens: (0, b, 0)),  # x time-major
            pl.BlockSpec((D, 6 * H), lambda b, lens: (0, 0)),          # wih (bf16)
            pl.BlockSpec((1, 6 * H), lambda b, lens: (0, 0)),          # bih
            pl.BlockSpec((6, H, H), lambda b, lens: (0, 0, 0)),        # whh
            pl.BlockSpec((6, 1, H), lambda b, lens: (0, 0, 0)),        # bhh
        ],
        out_specs=[
            pl.BlockSpec((S, block_b, joint), lambda b, lens: (0, b, 0)),
            pl.BlockSpec((block_b, joint), lambda b, lens: (b, 0)),
        ],
        scratch_shapes=[pltpu.VMEM((6, S, block_b, H), jnp.float32)],
    )

    cost = pl.CostEstimate(
        flops=2 * Bp * S * D * 6 * H + 2 * Bp * S * 6 * H * H,
        transcendentals=Bp * S * 6 * H,
        bytes_accessed=4 * (Bp * S * D + Bp * S * joint + Bp * joint)
                       + 2 * D * 6 * H + 4 * (6 * H * H + 6 * H),
    )

    seq_t, glob = pl.pallas_call(
        functools.partial(_bigru_kernel, S=S, D=D, H=H, Bblk=block_b, eps=eps),
        out_shape=(
            jax.ShapeDtypeStruct((S, Bp, joint), jnp.float32),
            jax.ShapeDtypeStruct((Bp, joint), jnp.float32),
        ),
        grid_spec=grid_spec,
        compiler_params=pltpu.CompilerParams(
            dimension_semantics=("parallel",)),   # batch blocks across v7x's 2 TCs
        cost_estimate=cost,
    )(lengths_p, lens2d, x_t, params["wih"], params["bih"],
      params["whh"], params["bhh"])

    seq = jnp.transpose(seq_t, (1, 0, 2))[:B]               # (B, S, joint)
    glob = glob[:B]
    # Padding mask (1 where t >= length): one broadcasted compare (wrapper).
    mask = (jnp.arange(S, dtype=jnp.int32)[None, :] >= lengths[:, None]
            ).astype(jnp.int32)
    return glob, seq, mask


# ----------------------------------------------------------------------------
# Deterministic parameter init (orthogonal weights, like the PyTorch module)
# ----------------------------------------------------------------------------
def init_params(key, word_dim, joint_dim):
    H = joint_dim // 2
    ortho = jax.nn.initializers.orthogonal()
    k = jax.random.split(key, 8)
    # PyTorch GRU layout: weight_ih (3H, D), weight_hh (3H, H), gates [r|z|n].
    w_ih_f = ortho(k[0], (3 * H, word_dim), jnp.float32)
    w_hh_f = ortho(k[1], (3 * H, H), jnp.float32)
    w_ih_b = ortho(k[2], (3 * H, word_dim), jnp.float32)
    w_hh_b = ortho(k[3], (3 * H, H), jnp.float32)
    bound = 1.0 / math.sqrt(H)

    def unif(kk, shape):
        return jax.random.uniform(kk, shape, jnp.float32, -bound, bound)

    b_ih_f, b_hh_f = unif(k[4], (3 * H,)), unif(k[5], (3 * H,))
    b_ih_b, b_hh_b = unif(k[6], (3 * H,)), unif(k[7], (3 * H,))

    # Host-side repack (once):
    #  * wih: single (D, 6H) bf16 input-projection weight, both directions,
    #    columns [f_r|f_z|f_n|b_r|b_z|b_n]  -> one MXU pass per batch block.
    #  * whh/bhh: per-(direction,gate) recurrent weights (6,H,H)/(6,1,H),
    #    pre-transposed so the time loop needs no lane slicing.
    def split_gates_T(w):                 # (3H, X) -> [(X, H)] * 3
        return [w[g * H:(g + 1) * H].T for g in range(3)]

    whh = jnp.stack(split_gates_T(w_hh_f) + split_gates_T(w_hh_b))      # (6,H,H)
    bhh = jnp.stack([b[g * H:(g + 1) * H].reshape(1, H)
                     for b in (b_hh_f, b_hh_b) for g in range(3)])      # (6,1,H)
    return {
        "wih": jnp.concatenate([w_ih_f.T, w_ih_b.T], axis=1).astype(jnp.bfloat16),
        "bih": jnp.concatenate([b_ih_f, b_ih_b]).reshape(1, 6 * H),
        "whh": whh,
        "bhh": bhh,
    }


# ----------------------------------------------------------------------------
# Pure-JAX reference (same math, for correctness cross-check)
# ----------------------------------------------------------------------------
def _reference_forward(params, sentences, lengths):
    B, S, D = sentences.shape
    H = params["whh"].shape[-1]
    gi = jnp.dot(sentences.reshape(B * S, D).astype(jnp.bfloat16), params["wih"],
                 preferred_element_type=jnp.float32).reshape(B, S, 6 * H)
    gi = gi + params["bih"]
    lens = lengths[:, None]

    def cell(h, gr, gz, gn, gd):
        gh_r = h @ params["whh"][gd + 0] + params["bhh"][gd + 0]
        gh_z = h @ params["whh"][gd + 1] + params["bhh"][gd + 1]
        gh_n = h @ params["whh"][gd + 2] + params["bhh"][gd + 2]
        r = jax.nn.sigmoid(gr + gh_r)
        z = jax.nn.sigmoid(gz + gh_z)
        n = jnp.tanh(gn + r * gh_n)
        return (1.0 - z) * n + z * h

    h_f = jnp.zeros((B, H), jnp.float32)
    outs_f = []
    for t in range(S):
        v = t < lens
        h_f = jnp.where(v, cell(h_f, gi[:, t, 0:H], gi[:, t, H:2 * H],
                                gi[:, t, 2 * H:3 * H], 0), h_f)
        outs_f.append(jnp.where(v, h_f, 0.0))
    h_b = jnp.zeros((B, H), jnp.float32)
    outs_b = [None] * S
    for t in range(S - 1, -1, -1):
        v = t < lens
        h_b = jnp.where(v, cell(h_b, gi[:, t, 3 * H:4 * H], gi[:, t, 4 * H:5 * H],
                                gi[:, t, 5 * H:6 * H], 3), h_b)
        outs_b[t] = jnp.where(v, h_b, 0.0)
    seq = jnp.stack([jnp.concatenate([outs_f[t], outs_b[t]], -1)
                     for t in range(S)], axis=1)
    glob = jnp.concatenate([h_f, h_b], axis=-1)
    glob = glob * lax.rsqrt(jnp.maximum(jnp.sum(glob * glob, -1, keepdims=True),
                                        1e-12))
    mask = (jnp.arange(S)[None, :] >= lengths[:, None]).astype(jnp.int32)
    return glob, seq, mask


# ----------------------------------------------------------------------------
if __name__ == "__main__":
    word_dim = 32      # opt.word_dim
    joint_dim = 32     # opt.joint_dim (hidden per direction = 16)
    B, S = 10, 8

    key = jax.random.PRNGKey(0)
    kp, kx = jax.random.split(key)

    params = init_params(kp, word_dim, joint_dim)
    sentences = jax.random.normal(kx, (B, S, word_dim), jnp.float32)
    # sorted descending, like pack_padded_sequence expects; ragged lengths
    sentence_lengths = jnp.array([8, 8, 7, 7, 6, 5, 4, 3, 2, 1], jnp.int32)

    glob, seq, mask = text_encoder_gru_forward(params, sentences,
                                               sentence_lengths, block_b=8)
    glob, seq, mask = jax.block_until_ready((glob, seq, mask))

    assert glob.shape == (B, joint_dim)
    assert seq.shape == (B, S, joint_dim)
    assert mask.shape == (B, S)
    assert bool(jnp.all(jnp.isfinite(glob))) and bool(jnp.all(jnp.isfinite(seq)))
    # global sentence vectors are L2-normalized
    assert bool(jnp.all(jnp.abs(jnp.linalg.norm(glob, axis=-1) - 1.0) < 1e-3))
    # packed-sequence semantics: padded timesteps are exact zeros
    for b in range(B):
        L = int(sentence_lengths[b])
        assert bool(jnp.all(seq[b, L:, :] == 0.0))
    # padding mask marks positions >= length
    assert bool(jnp.all(mask == (jnp.arange(S)[None, :]
                                 >= sentence_lengths[:, None])))

    # cross-check against a pure-JAX reference of the same math
    g_ref, s_ref, m_ref = _reference_forward(params, sentences, sentence_lengths)
    assert bool(jnp.allclose(glob, g_ref, atol=5e-2, rtol=5e-2))
    assert bool(jnp.allclose(seq, s_ref, atol=5e-2, rtol=5e-2))
    assert bool(jnp.all(mask == m_ref))
    print("KERNEL_OK")
</pallas_src>

<mosaic_0001>
module attributes {stable_mosaic.version = 11 : i64} {
  func.func @_bigru_kernel(%arg0: i32, %arg1: memref<16xi32, #tpu.memory_space<smem>>, %arg2: memref<8x1xi32, #tpu.memory_space<vmem>>, %arg3: memref<8x8x32xf32, #tpu.memory_space<vmem>>, %arg4: memref<32x96xbf16, #tpu.memory_space<vmem>>, %arg5: memref<1x96xf32, #tpu.memory_space<vmem>>, %arg6: memref<6x16x16xf32, #tpu.memory_space<vmem>>, %arg7: memref<6x1x16xf32, #tpu.memory_space<vmem>>, %arg8: memref<8x8x32xf32, #tpu.memory_space<vmem>>, %arg9: memref<8x32xf32, #tpu.memory_space<vmem>>, %arg10: memref<6x8x8x16xf32, #tpu.memory_space<vmem>>) attributes {dimension_semantics = [#tpu.dimension_semantics<parallel>], iteration_bounds = array<i64: 2>, scalar_prefetch = 1 : i64, scratch_operands = 1 : i64, tpu.core_type = #tpu.core_type<tc>, window_params = [{transform_indices = @transform_0, window_bounds = array<i64: 8, 1>}, {transform_indices = @transform_1, window_bounds = array<i64: 8, 8, 32>}, {pipeline_mode = #tpu.pipeline_mode<synchronous>, transform_indices = @transform_2, window_bounds = array<i64: 32, 96>}, {pipeline_mode = #tpu.pipeline_mode<synchronous>, transform_indices = @transform_3, window_bounds = array<i64: 1, 96>}, {pipeline_mode = #tpu.pipeline_mode<synchronous>, transform_indices = @transform_4, window_bounds = array<i64: 6, 16, 16>}, {pipeline_mode = #tpu.pipeline_mode<synchronous>, transform_indices = @transform_5, window_bounds = array<i64: 6, 1, 16>}, {transform_indices = @transform_6, window_bounds = array<i64: 8, 8, 32>}, {transform_indices = @transform_7, window_bounds = array<i64: 8, 32>}]} {
    %c8_i32 = arith.constant 8 : i32
    %0 = arith.muli %arg0, %c8_i32 : i32
    %1 = arith.index_cast %0 : i32 to index
    %2 = memref.load %arg1[%1] : memref<16xi32, #tpu.memory_space<smem>>
    %c1_i32 = arith.constant 1 : i32
    %3 = arith.addi %0, %c1_i32 : i32
    %4 = arith.index_cast %3 : i32 to index
    %5 = memref.load %arg1[%4] : memref<16xi32, #tpu.memory_space<smem>>
    %6 = arith.maxsi %2, %5 : i32
    %c2_i32 = arith.constant 2 : i32
    %7 = arith.addi %0, %c2_i32 : i32
    %8 = arith.index_cast %7 : i32 to index
    %9 = memref.load %arg1[%8] : memref<16xi32, #tpu.memory_space<smem>>
    %10 = arith.maxsi %6, %9 : i32
    %c3_i32 = arith.constant 3 : i32
    %11 = arith.addi %0, %c3_i32 : i32
    %12 = arith.index_cast %11 : i32 to index
    %13 = memref.load %arg1[%12] : memref<16xi32, #tpu.memory_space<smem>>
    %14 = arith.maxsi %10, %13 : i32
    %c4_i32 = arith.constant 4 : i32
    %15 = arith.addi %0, %c4_i32 : i32
    %16 = arith.index_cast %15 : i32 to index
    %17 = memref.load %arg1[%16] : memref<16xi32, #tpu.memory_space<smem>>
    %18 = arith.maxsi %14, %17 : i32
    %c5_i32 = arith.constant 5 : i32
    %19 = arith.addi %0, %c5_i32 : i32
    %20 = arith.index_cast %19 : i32 to index
    %21 = memref.load %arg1[%20] : memref<16xi32, #tpu.memory_space<smem>>
    %22 = arith.maxsi %18, %21 : i32
    %c6_i32 = arith.constant 6 : i32
    %23 = arith.addi %0, %c6_i32 : i32
    %24 = arith.index_cast %23 : i32 to index
    %25 = memref.load %arg1[%24] : memref<16xi32, #tpu.memory_space<smem>>
    %26 = arith.maxsi %22, %25 : i32
    %c7_i32 = arith.constant 7 : i32
    %27 = arith.addi %0, %c7_i32 : i32
    %28 = arith.index_cast %27 : i32 to index
    %29 = memref.load %arg1[%28] : memref<16xi32, #tpu.memory_space<smem>>
    %30 = arith.maxsi %26, %29 : i32
    %c0 = arith.constant 0 : index
    %c0_0 = arith.constant 0 : index
    %31 = vector.load %arg2[%c0, %c0_0] : memref<8x1xi32, #tpu.memory_space<vmem>>, vector<8x1xi32>
    %cst = arith.constant 0.000000e+00 : f32
    %32 = vector.broadcast %cst : f32 to vector<8x8x32xf32>
    %c0_1 = arith.constant 0 : index
    %c0_2 = arith.constant 0 : index
    %c0_3 = arith.constant 0 : index
    %33 = vector.load %arg8[%c0_1, %c0_2, %c0_3] : memref<8x8x32xf32, #tpu.memory_space<vmem>>, vector<8x8x32xf32>
    tpu.vector_store %arg8[%c0_1, %c0_2, %c0_3], %32 {strides = array<i32>} : memref<8x8x32xf32, #tpu.memory_space<vmem>>, vector<8x8x32xf32>,
    %c0_4 = arith.constant 0 : index
    %c0_5 = arith.constant 0 : index
    %c0_6 = arith.constant 0 : index
    %34 = vector.load %arg3[%c0_4, %c0_5, %c0_6] : memref<8x8x32xf32, #tpu.memory_space<vmem>>, vector<8x8x32xf32>
    %35 = vector.shape_cast %34 : vector<8x8x32xf32> to vector<64x32xf32>
    %36 = arith.truncf %35 : vector<64x32xf32> to vector<64x32xbf16>
    %c0_7 = arith.constant 0 : index
    %c0_8 = arith.constant 0 : index
    %37 = vector.load %arg4[%c0_7, %c0_8] : memref<32x96xbf16, #tpu.memory_space<vmem>>, vector<32x96xbf16>
    %cst_9 = arith.constant dense<0.000000e+00> : vector<64x96xf32>
    %38 = tpu.matmul %36, %37, %cst_9 {dimension_numbers = #tpu.dot_dimension_numbers<[1], [0], [0], [1], [0, 0, 1, 1], [], []>} : vector<64x32xbf16>, vector<32x96xbf16>, vector<64x96xf32> -> vector<64x96xf32>
    %c0_10 = arith.constant 0 : index
    %c0_11 = arith.constant 0 : index
    %39 = vector.load %arg5[%c0_10, %c0_11] : memref<1x96xf32, #tpu.memory_space<vmem>>, vector<1x96xf32>
    %40 = vector.broadcast %39 : vector<1x96xf32> to vector<64x96xf32>
    %41 = arith.addf %38, %40 : vector<64x96xf32>
    %42 = vector.extract_strided_slice %41 {offsets = [0, 0], sizes = [64, 16], strides = [1, 1]} : vector<64x96xf32> to vector<64x16xf32>
    %43 = vector.shape_cast %42 : vector<64x16xf32> to vector<8x8x16xf32>
    %c0_12 = arith.constant 0 : index
    %c0_13 = arith.constant 0 : index
    %c0_14 = arith.constant 0 : index
    %c0_15 = arith.constant 0 : index
    %44 = vector.load %arg10[%c0_12, %c0_13, %c0_14, %c0_15] : memref<6x8x8x16xf32, #tpu.memory_space<vmem>>, vector<1x8x8x16xf32>
    %45 = vector.shape_cast %44 : vector<1x8x8x16xf32> to vector<8x8x16xf32>
    %46 = vector.shape_cast %43 : vector<8x8x16xf32> to vector<1x8x8x16xf32>
    tpu.vector_store %arg10[%c0_12, %c0_13, %c0_14, %c0_15], %46 {strides = array<i32>} : memref<6x8x8x16xf32, #tpu.memory_space<vmem>>, vector<1x8x8x16xf32>,
    %47 = vector.extract_strided_slice %41 {offsets = [0, 16], sizes = [64, 16], strides = [1, 1]} : vector<64x96xf32> to vector<64x16xf32>
    %48 = vector.shape_cast %47 : vector<64x16xf32> to vector<8x8x16xf32>
    %c1 = arith.constant 1 : index
    %c0_16 = arith.constant 0 : index
    %c0_17 = arith.constant 0 : index
    %c0_18 = arith.constant 0 : index
    %49 = vector.load %arg10[%c1, %c0_16, %c0_17, %c0_18] : memref<6x8x8x16xf32, #tpu.memory_space<vmem>>, vector<1x8x8x16xf32>
    %50 = vector.shape_cast %49 : vector<1x8x8x16xf32> to vector<8x8x16xf32>
    %51 = vector.shape_cast %48 : vector<8x8x16xf32> to vector<1x8x8x16xf32>
    tpu.vector_store %arg10[%c1, %c0_16, %c0_17, %c0_18], %51 {strides = array<i32>} : memref<6x8x8x16xf32, #tpu.memory_space<vmem>>, vector<1x8x8x16xf32>,
    %52 = vector.extract_strided_slice %41 {offsets = [0, 32], sizes = [64, 16], strides = [1, 1]} : vector<64x96xf32> to vector<64x16xf32>
    %53 = vector.shape_cast %52 : vector<64x16xf32> to vector<8x8x16xf32>
    %c2 = arith.constant 2 : index
    %c0_19 = arith.constant 0 : index
    %c0_20 = arith.constant 0 : index
    %c0_21 = arith.constant 0 : index
    %54 = vector.load %arg10[%c2, %c0_19, %c0_20, %c0_21] : memref<6x8x8x16xf32, #tpu.memory_space<vmem>>, vector<1x8x8x16xf32>
    %55 = vector.shape_cast %54 : vector<1x8x8x16xf32> to vector<8x8x16xf32>
    %56 = vector.shape_cast %53 : vector<8x8x16xf32> to vector<1x8x8x16xf32>
    tpu.vector_store %arg10[%c2, %c0_19, %c0_20, %c0_21], %56 {strides = array<i32>} : memref<6x8x8x16xf32, #tpu.memory_space<vmem>>, vector<1x8x8x16xf32>,
    %57 = vector.extract_strided_slice %41 {offsets = [0, 48], sizes = [64, 16], strides = [1, 1]} : vector<64x96xf32> to vector<64x16xf32>
    %58 = vector.shape_cast %57 : vector<64x16xf32> to vector<8x8x16xf32>
    %c3 = arith.constant 3 : index
    %c0_22 = arith.constant 0 : index
    %c0_23 = arith.constant 0 : index
    %c0_24 = arith.constant 0 : index
    %59 = vector.load %arg10[%c3, %c0_22, %c0_23, %c0_24] : memref<6x8x8x16xf32, #tpu.memory_space<vmem>>, vector<1x8x8x16xf32>
    %60 = vector.shape_cast %59 : vector<1x8x8x16xf32> to vector<8x8x16xf32>
    %61 = vector.shape_cast %58 : vector<8x8x16xf32> to vector<1x8x8x16xf32>
    tpu.vector_store %arg10[%c3, %c0_22, %c0_23, %c0_24], %61 {strides = array<i32>} : memref<6x8x8x16xf32, #tpu.memory_space<vmem>>, vector<1x8x8x16xf32>,
    %62 = vector.extract_strided_slice %41 {offsets = [0, 64], sizes = [64, 16], strides = [1, 1]} : vector<64x96xf32> to vector<64x16xf32>
    %63 = vector.shape_cast %62 : vector<64x16xf32> to vector<8x8x16xf32>
    %c4 = arith.constant 4 : index
    %c0_25 = arith.constant 0 : index
    %c0_26 = arith.constant 0 : index
    %c0_27 = arith.constant 0 : index
    %64 = vector.load %arg10[%c4, %c0_25, %c0_26, %c0_27] : memref<6x8x8x16xf32, #tpu.memory_space<vmem>>, vector<1x8x8x16xf32>
    %65 = vector.shape_cast %64 : vector<1x8x8x16xf32> to vector<8x8x16xf32>
    %66 = vector.shape_cast %63 : vector<8x8x16xf32> to vector<1x8x8x16xf32>
    tpu.vector_store %arg10[%c4, %c0_25, %c0_26, %c0_27], %66 {strides = array<i32>} : memref<6x8x8x16xf32, #tpu.memory_space<vmem>>, vector<1x8x8x16xf32>,
    %67 = vector.extract_strided_slice %41 {offsets = [0, 80], sizes = [64, 16], strides = [1, 1]} : vector<64x96xf32> to vector<64x16xf32>
    %68 = vector.shape_cast %67 : vector<64x16xf32> to vector<8x8x16xf32>
    %c5 = arith.constant 5 : index
    %c0_28 = arith.constant 0 : index
    %c0_29 = arith.constant 0 : index
    %c0_30 = arith.constant 0 : index
    %69 = vector.load %arg10[%c5, %c0_28, %c0_29, %c0_30] : memref<6x8x8x16xf32, #tpu.memory_space<vmem>>, vector<1x8x8x16xf32>
    %70 = vector.shape_cast %69 : vector<1x8x8x16xf32> to vector<8x8x16xf32>
    %71 = vector.shape_cast %68 : vector<8x8x16xf32> to vector<1x8x8x16xf32>
    tpu.vector_store %arg10[%c5, %c0_28, %c0_29, %c0_30], %71 {strides = array<i32>} : memref<6x8x8x16xf32, #tpu.memory_space<vmem>>, vector<1x8x8x16xf32>,
    %cst_31 = arith.constant 0.000000e+00 : f32
    %72 = vector.broadcast %cst_31 : f32 to vector<8x16xf32>
    %c0_i32 = arith.constant 0 : i32
    %73 = arith.subi %30, %c0_i32 : i32
    %74 = arith.addi %c0_i32, %73 : i32
    %c1_i32_32 = arith.constant 1 : i32
    %75:2 = scf.for %arg11 = %c0_i32 to %74 step %c1_i32_32 iter_args(%arg12 = %72, %arg13 = %72) -> (vector<8x16xf32>, vector<8x16xf32>)  : i32 {
      %86 = vector.broadcast %arg11 : i32 to vector<8x1xi32>
      %87 = arith.cmpi slt, %86, %31 : vector<8x1xi32>
      %c0_37 = arith.constant 0 : index
      %88 = arith.index_cast %arg11 : i32 to index
      %c0_38 = arith.constant 0 : index
      %c0_39 = arith.constant 0 : index
      %89 = vector.load %arg10[%c0_37, %88, %c0_38, %c0_39] : memref<6x8x8x16xf32, #tpu.memory_space<vmem>>, vector<1x1x8x16xf32>
      %90 = vector.shape_cast %89 : vector<1x1x8x16xf32> to vector<8x16xf32>
      %c1_40 = arith.constant 1 : index
      %91 = arith.index_cast %arg11 : i32 to index
      %c0_41 = arith.constant 0 : index
      %c0_42 = arith.constant 0 : index
      %92 = vector.load %arg10[%c1_40, %91, %c0_41, %c0_42] : memref<6x8x8x16xf32, #tpu.memory_space<vmem>>, vector<1x1x8x16xf32>
      %93 = vector.shape_cast %92 : vector<1x1x8x16xf32> to vector<8x16xf32>
      %c2_43 = arith.constant 2 : index
      %94 = arith.index_cast %arg11 : i32 to index
      %c0_44 = arith.constant 0 : index
      %c0_45 = arith.constant 0 : index
      %95 = vector.load %arg10[%c2_43, %94, %c0_44, %c0_45] : memref<6x8x8x16xf32, #tpu.memory_space<vmem>>, vector<1x1x8x16xf32>
      %96 = vector.shape_cast %95 : vector<1x1x8x16xf32> to vector<8x16xf32>
      %c0_46 = arith.constant 0 : index
      %c0_47 = arith.constant 0 : index
      %c0_48 = arith.constant 0 : index
      %97 = vector.load %arg6[%c0_46, %c0_47, %c0_48] : memref<6x16x16xf32, #tpu.memory_space<vmem>>, vector<1x16x16xf32>
      %98 = vector.shape_cast %97 : vector<1x16x16xf32> to vector<16x16xf32>
      %cst_49 = arith.constant dense<0.000000e+00> : vector<8x16xf32>
      %99 = tpu.matmul %arg12, %98, %cst_49 {dimension_numbers = #tpu.dot_dimension_numbers<[1], [0], [0], [1], [0, 0, 1, 1], [], []>} : vector<8x16xf32>, vector<16x16xf32>, vector<8x16xf32> -> vector<8x16xf32>
      %c0_50 = arith.constant 0 : index
      %c0_51 = arith.constant 0 : index
      %c0_52 = arith.constant 0 : index
      %100 = vector.load %arg7[%c0_50, %c0_51, %c0_52] : memref<6x1x16xf32, #tpu.memory_space<vmem>>, vector<1x1x16xf32>
      %101 = vector.shape_cast %100 : vector<1x1x16xf32> to vector<1x16xf32>
      %102 = vector.broadcast %101 : vector<1x16xf32> to vector<8x16xf32>
      %103 = arith.addf %99, %102 : vector<8x16xf32>
      %c1_53 = arith.constant 1 : index
      %c0_54 = arith.constant 0 : index
      %c0_55 = arith.constant 0 : index
      %104 = vector.load %arg6[%c1_53, %c0_54, %c0_55] : memref<6x16x16xf32, #tpu.memory_space<vmem>>, vector<1x16x16xf32>
      %105 = vector.shape_cast %104 : vector<1x16x16xf32> to vector<16x16xf32>
      %cst_56 = arith.constant dense<0.000000e+00> : vector<8x16xf32>
      %106 = tpu.matmul %arg12, %105, %cst_56 {dimension_numbers = #tpu.dot_dimension_numbers<[1], [0], [0], [1], [0, 0, 1, 1], [], []>} : vector<8x16xf32>, vector<16x16xf32>, vector<8x16xf32> -> vector<8x16xf32>
      %c1_57 = arith.constant 1 : index
      %c0_58 = arith.constant 0 : index
      %c0_59 = arith.constant 0 : index
      %107 = vector.load %arg7[%c1_57, %c0_58, %c0_59] : memref<6x1x16xf32, #tpu.memory_space<vmem>>, vector<1x1x16xf32>
      %108 = vector.shape_cast %107 : vector<1x1x16xf32> to vector<1x16xf32>
      %109 = vector.broadcast %108 : vector<1x16xf32> to vector<8x16xf32>
      %110 = arith.addf %106, %109 : vector<8x16xf32>
      %c2_60 = arith.constant 2 : index
      %c0_61 = arith.constant 0 : index
      %c0_62 = arith.constant 0 : index
      %111 = vector.load %arg6[%c2_60, %c0_61, %c0_62] : memref<6x16x16xf32, #tpu.memory_space<vmem>>, vector<1x16x16xf32>
      %112 = vector.shape_cast %111 : vector<1x16x16xf32> to vector<16x16xf32>
      %cst_63 = arith.constant dense<0.000000e+00> : vector<8x16xf32>
      %113 = tpu.matmul %arg12, %112, %cst_63 {dimension_numbers = #tpu.dot_dimension_numbers<[1], [0], [0], [1], [0, 0, 1, 1], [], []>} : vector<8x16xf32>, vector<16x16xf32>, vector<8x16xf32> -> vector<8x16xf32>
      %c2_64 = arith.constant 2 : index
      %c0_65 = arith.constant 0 : index
      %c0_66 = arith.constant 0 : index
      %114 = vector.load %arg7[%c2_64, %c0_65, %c0_66] : memref<6x1x16xf32, #tpu.memory_space<vmem>>, vector<1x1x16xf32>
      %115 = vector.shape_cast %114 : vector<1x1x16xf32> to vector<1x16xf32>
      %116 = vector.broadcast %115 : vector<1x16xf32> to vector<8x16xf32>
      %117 = arith.addf %113, %116 : vector<8x16xf32>
      %118 = arith.addf %90, %103 : vector<8x16xf32>
      %119 = arith.negf %118 : vector<8x16xf32>
      %120 = math.exp %119 : vector<8x16xf32>
      %cst_67 = arith.constant 1.000000e+00 : f32
      %121 = vector.broadcast %cst_67 : f32 to vector<8x16xf32>
      %122 = arith.addf %121, %120 : vector<8x16xf32>
      %123 = arith.divf %121, %122 : vector<8x16xf32>
      %124 = arith.addf %93, %110 : vector<8x16xf32>
      %125 = arith.negf %124 : vector<8x16xf32>
      %126 = math.exp %125 : vector<8x16xf32>
      %cst_68 = arith.constant 1.000000e+00 : f32
      %127 = vector.broadcast %cst_68 : f32 to vector<8x16xf32>
      %128 = arith.addf %127, %126 : vector<8x16xf32>
      %129 = arith.divf %127, %128 : vector<8x16xf32>
      %130 = arith.mulf %123, %117 : vector<8x16xf32>
      %131 = arith.addf %96, %130 : vector<8x16xf32>
      %132 = math.tanh %131 : vector<8x16xf32>
      %cst_69 = arith.constant 1.000000e+00 : f32
      %133 = vector.broadcast %cst_69 : f32 to vector<8x16xf32>
      %134 = arith.subf %133, %129 : vector<8x16xf32>
      %135 = arith.mulf %134, %132 : vector<8x16xf32>
      %136 = arith.mulf %129, %arg12 : vector<8x16xf32>
      %137 = arith.addf %135, %136 : vector<8x16xf32>
      %138 = vector.shape_cast %87 : vector<8x1xi1> to vector<8x1xi1>
      %139 = vector.broadcast %138 : vector<8x1xi1> to vector<8x16xi1>
      %140 = arith.select %139, %137, %arg12 : vector<8x16xi1>, vector<8x16xf32>
      %cst_70 = arith.constant 0.000000e+00 : f32
      %141 = vector.shape_cast %87 : vector<8x1xi1> to vector<8x1xi1>
      %142 = vector.broadcast %141 : vector<8x1xi1> to vector<8x16xi1>
      %143 = vector.broadcast %cst_70 : f32 to vector<8x16xf32>
      %144 = arith.select %142, %140, %143 : vector<8x16xi1>, vector<8x16xf32>
      %145 = arith.index_cast %arg11 : i32 to index
      %c0_71 = arith.constant 0 : index
      %c0_72 = arith.constant 0 : index
      %146 = vector.load %arg8[%145, %c0_71, %c0_72] : memref<8x8x32xf32, #tpu.memory_space<vmem>>, vector<1x8x16xf32>
      %147 = vector.shape_cast %146 : vector<1x8x16xf32> to vector<8x16xf32>
      %148 = vector.shape_cast %144 : vector<8x16xf32> to vector<1x8x16xf32>
      tpu.vector_store %arg8[%145, %c0_71, %c0_72], %148 {strides = array<i32>} : memref<8x8x32xf32, #tpu.memory_space<vmem>>, vector<1x8x16xf32>,
      %c1_i32_73 = arith.constant 1 : i32
      %149 = arith.subi %30, %c1_i32_73 : i32
      %150 = arith.subi %149, %arg11 : i32
      %151 = vector.broadcast %150 : i32 to vector<8x1xi32>
      %152 = arith.cmpi slt, %151, %31 : vector<8x1xi32>
      %c3_74 = arith.constant 3 : index
      %153 = arith.index_cast %150 : i32 to index
      %c0_75 = arith.constant 0 : index
      %c0_76 = arith.constant 0 : index
      %154 = vector.load %arg10[%c3_74, %153, %c0_75, %c0_76] : memref<6x8x8x16xf32, #tpu.memory_space<vmem>>, vector<1x1x8x16xf32>
      %155 = vector.shape_cast %154 : vector<1x1x8x16xf32> to vector<8x16xf32>
      %c4_77 = arith.constant 4 : index
      %156 = arith.index_cast %150 : i32 to index
      %c0_78 = arith.constant 0 : index
      %c0_79 = arith.constant 0 : index
      %157 = vector.load %arg10[%c4_77, %156, %c0_78, %c0_79] : memref<6x8x8x16xf32, #tpu.memory_space<vmem>>, vector<1x1x8x16xf32>
      %158 = vector.shape_cast %157 : vector<1x1x8x16xf32> to vector<8x16xf32>
      %c5_80 = arith.constant 5 : index
      %159 = arith.index_cast %150 : i32 to index
      %c0_81 = arith.constant 0 : index
      %c0_82 = arith.constant 0 : index
      %160 = vector.load %arg10[%c5_80, %159, %c0_81, %c0_82] : memref<6x8x8x16xf32, #tpu.memory_space<vmem>>, vector<1x1x8x16xf32>
      %161 = vector.shape_cast %160 : vector<1x1x8x16xf32> to vector<8x16xf32>
      %c3_83 = arith.constant 3 : index
      %c0_84 = arith.constant 0 : index
      %c0_85 = arith.constant 0 : index
      %162 = vector.load %arg6[%c3_83, %c0_84, %c0_85] : memref<6x16x16xf32, #tpu.memory_space<vmem>>, vector<1x16x16xf32>
      %163 = vector.shape_cast %162 : vector<1x16x16xf32> to vector<16x16xf32>
      %cst_86 = arith.constant dense<0.000000e+00> : vector<8x16xf32>
      %164 = tpu.matmul %arg13, %163, %cst_86 {dimension_numbers = #tpu.dot_dimension_numbers<[1], [0], [0], [1], [0, 0, 1, 1], [], []>} : vector<8x16xf32>, vector<16x16xf32>, vector<8x16xf32> -> vector<8x16xf32>
      %c3_87 = arith.constant 3 : index
      %c0_88 = arith.constant 0 : index
      %c0_89 = arith.constant 0 : index
      %165 = vector.load %arg7[%c3_87, %c0_88, %c0_89] : memref<6x1x16xf32, #tpu.memory_space<vmem>>, vector<1x1x16xf32>
      %166 = vector.shape_cast %165 : vector<1x1x16xf32> to vector<1x16xf32>
      %167 = vector.broadcast %166 : vector<1x16xf32> to vector<8x16xf32>
      %168 = arith.addf %164, %167 : vector<8x16xf32>
      %c4_90 = arith.constant 4 : index
      %c0_91 = arith.constant 0 : index
      %c0_92 = arith.constant 0 : index
      %169 = vector.load %arg6[%c4_90, %c0_91, %c0_92] : memref<6x16x16xf32, #tpu.memory_space<vmem>>, vector<1x16x16xf32>
      %170 = vector.shape_cast %169 : vector<1x16x16xf32> to vector<16x16xf32>
      %cst_93 = arith.constant dense<0.000000e+00> : vector<8x16xf32>
      %171 = tpu.matmul %arg13, %170, %cst_93 {dimension_numbers = #tpu.dot_dimension_numbers<[1], [0], [0], [1], [0, 0, 1, 1], [], []>} : vector<8x16xf32>, vector<16x16xf32>, vector<8x16xf32> -> vector<8x16xf32>
      %c4_94 = arith.constant 4 : index
      %c0_95 = arith.constant 0 : index
      %c0_96 = arith.constant 0 : index
      %172 = vector.load %arg7[%c4_94, %c0_95, %c0_96] : memref<6x1x16xf32, #tpu.memory_space<vmem>>, vector<1x1x16xf32>
      %173 = vector.shape_cast %172 : vector<1x1x16xf32> to vector<1x16xf32>
      %174 = vector.broadcast %173 : vector<1x16xf32> to vector<8x16xf32>
      %175 = arith.addf %171, %174 : vector<8x16xf32>
      %c5_97 = arith.constant 5 : index
      %c0_98 = arith.constant 0 : index
      %c0_99 = arith.constant 0 : index
      %176 = vector.load %arg6[%c5_97, %c0_98, %c0_99] : memref<6x16x16xf32, #tpu.memory_space<vmem>>, vector<1x16x16xf32>
      %177 = vector.shape_cast %176 : vector<1x16x16xf32> to vector<16x16xf32>
      %cst_100 = arith.constant dense<0.000000e+00> : vector<8x16xf32>
      %178 = tpu.matmul %arg13, %177, %cst_100 {dimension_numbers = #tpu.dot_dimension_numbers<[1], [0], [0], [1], [0, 0, 1, 1], [], []>} : vector<8x16xf32>, vector<16x16xf32>, vector<8x16xf32> -> vector<8x16xf32>
      %c5_101 = arith.constant 5 : index
      %c0_102 = arith.constant 0 : index
      %c0_103 = arith.constant 0 : index
      %179 = vector.load %arg7[%c5_101, %c0_102, %c0_103] : memref<6x1x16xf32, #tpu.memory_space<vmem>>, vector<1x1x16xf32>
      %180 = vector.shape_cast %179 : vector<1x1x16xf32> to vector<1x16xf32>
      %181 = vector.broadcast %180 : vector<1x16xf32> to vector<8x16xf32>
      %182 = arith.addf %178, %181 : vector<8x16xf32>
      %183 = arith.addf %155, %168 : vector<8x16xf32>
      %184 = arith.negf %183 : vector<8x16xf32>
      %185 = math.exp %184 : vector<8x16xf32>
      %cst_104 = arith.constant 1.000000e+00 : f32
      %186 = vector.broadcast %cst_104 : f32 to vector<8x16xf32>
      %187 = arith.addf %186, %185 : vector<8x16xf32>
      %188 = arith.divf %186, %187 : vector<8x16xf32>
      %189 = arith.addf %158, %175 : vector<8x16xf32>
      %190 = arith.negf %189 : vector<8x16xf32>
      %191 = math.exp %190 : vector<8x16xf32>
      %cst_105 = arith.constant 1.000000e+00 : f32
      %192 = vector.broadcast %cst_105 : f32 to vector<8x16xf32>
      %193 = arith.addf %192, %191 : vector<8x16xf32>
      %194 = arith.divf %192, %193 : vector<8x16xf32>
      %195 = arith.mulf %188, %182 : vector<8x16xf32>
      %196 = arith.addf %161, %195 : vector<8x16xf32>
      %197 = math.tanh %196 : vector<8x16xf32>
      %cst_106 = arith.constant 1.000000e+00 : f32
      %198 = vector.broadcast %cst_106 : f32 to vector<8x16xf32>
      %199 = arith.subf %198, %194 : vector<8x16xf32>
      %200 = arith.mulf %199, %197 : vector<8x16xf32>
      %201 = arith.mulf %194, %arg13 : vector<8x16xf32>
      %202 = arith.addf %200, %201 : vector<8x16xf32>
      %203 = vector.shape_cast %152 : vector<8x1xi1> to vector<8x1xi1>
      %204 = vector.broadcast %203 : vector<8x1xi1> to vector<8x16xi1>
      %205 = arith.select %204, %202, %arg13 : vector<8x16xi1>, vector<8x16xf32>
      %cst_107 = arith.constant 0.000000e+00 : f32
      %206 = vector.shape_cast %152 : vector<8x1xi1> to vector<8x1xi1>
      %207 = vector.broadcast %206 : vector<8x1xi1> to vector<8x16xi1>
      %208 = vector.broadcast %cst_107 : f32 to vector<8x16xf32>
      %209 = arith.select %207, %205, %208 : vector<8x16xi1>, vector<8x16xf32>
      %210 = arith.index_cast %150 : i32 to index
      %c0_108 = arith.constant 0 : index
      %c16 = arith.constant 16 : index
      %211 = vector.load %arg8[%210, %c0_108, %c16] : memref<8x8x32xf32, #tpu.memory_space<vmem>>, vector<1x8x16xf32>
      %212 = vector.shape_cast %211 : vector<1x8x16xf32> to vector<8x16xf32>
      %213 = vector.shape_cast %209 : vector<8x16xf32> to vector<1x8x16xf32>
      tpu.vector_store %arg8[%210, %c0_108, %c16], %213 {strides = array<i32>} : memref<8x8x32xf32, #tpu.memory_space<vmem>>, vector<1x8x16xf32>,
      scf.yield %140, %205 : vector<8x16xf32>, vector<8x16xf32>
    }
    %76 = tpu.concatenate %75#0, %75#1 in 1 : vector<8x16xf32>, vector<8x16xf32> -> vector<8x32xf32>
    %77 = arith.mulf %76, %76 : vector<8x32xf32>
    %cst_33 = arith.constant dense<0.000000e+00> : vector<8xf32>
    %78 = vector.multi_reduction <add>, %77, %cst_33 [1] : vector<8x32xf32> to vector<8xf32>
    %79 = vector.shape_cast %78 : vector<8xf32> to vector<8x1xf32>
    %cst_34 = arith.constant 9.99999996E-13 : f32
    %80 = vector.broadcast %cst_34 : f32 to vector<8x1xf32>
    %81 = arith.maximumf %79, %80 : vector<8x1xf32>
    %82 = math.rsqrt %81 : vector<8x1xf32>
    %83 = vector.broadcast %82 : vector<8x1xf32> to vector<8x32xf32>
    %84 = arith.mulf %76, %83 : vector<8x32xf32>
    %c0_35 = arith.constant 0 : index
    %c0_36 = arith.constant 0 : index
    %85 = vector.load %arg9[%c0_35, %c0_36] : memref<8x32xf32, #tpu.memory_space<vmem>>, vector<8x32xf32>
    tpu.vector_store %arg9[%c0_35, %c0_36], %84 {strides = array<i32>} : memref<8x32xf32, #tpu.memory_space<vmem>>, vector<8x32xf32>,
    return
  }
  func.func @transform_0(%arg0: i32, %arg1: memref<16xi32, #tpu.memory_space<smem>>) -> (i32, i32) {
    %c0_i32 = arith.constant 0 : i32
    %c0_i32_0 = arith.constant 0 : i32
    return %arg0, %c0_i32 : i32, i32
  }
  func.func @transform_1(%arg0: i32, %arg1: memref<16xi32, #tpu.memory_space<smem>>) -> (i32, i32, i32) {
    %c0_i32 = arith.constant 0 : i32
    %c0_i32_0 = arith.constant 0 : i32
    %c0_i32_1 = arith.constant 0 : i32
    return %c0_i32, %arg0, %c0_i32_0 : i32, i32, i32
  }
  func.func @transform_2(%arg0: i32, %arg1: memref<16xi32, #tpu.memory_space<smem>>) -> (i32, i32) {
    %c0_i32 = arith.constant 0 : i32
    %c0_i32_0 = arith.constant 0 : i32
    %c0_i32_1 = arith.constant 0 : i32
    return %c0_i32, %c0_i32_0 : i32, i32
  }
  func.func @transform_3(%arg0: i32, %arg1: memref<16xi32, #tpu.memory_space<smem>>) -> (i32, i32) {
    %c0_i32 = arith.constant 0 : i32
    %c0_i32_0 = arith.constant 0 : i32
    %c0_i32_1 = arith.constant 0 : i32
    return %c0_i32, %c0_i32_0 : i32, i32
  }
  func.func @transform_4(%arg0: i32, %arg1: memref<16xi32, #tpu.memory_space<smem>>) -> (i32, i32, i32) {
    %c0_i32 = arith.constant 0 : i32
    %c0_i32_0 = arith.constant 0 : i32
    %c0_i32_1 = arith.constant 0 : i32
    %c0_i32_2 = arith.constant 0 : i32
    return %c0_i32, %c0_i32_0, %c0_i32_1 : i32, i32, i32
  }
  func.func @transform_5(%arg0: i32, %arg1: memref<16xi32, #tpu.memory_space<smem>>) -> (i32, i32, i32) {
    %c0_i32 = arith.constant 0 : i32
    %c0_i32_0 = arith.constant 0 : i32
    %c0_i32_1 = arith.constant 0 : i32
    %c0_i32_2 = arith.constant 0 : i32
    return %c0_i32, %c0_i32_0, %c0_i32_1 : i32, i32, i32
  }
  func.func @transform_6(%arg0: i32, %arg1: memref<16xi32, #tpu.memory_space<smem>>) -> (i32, i32, i32) {
    %c0_i32 = arith.constant 0 : i32
    %c0_i32_0 = arith.constant 0 : i32
    %c0_i32_1 = arith.constant 0 : i32
    return %c0_i32, %arg0, %c0_i32_0 : i32, i32, i32
  }
  func.func @transform_7(%arg0: i32, %arg1: memref<16xi32, #tpu.memory_space<smem>>) -> (i32, i32) {
    %c0_i32 = arith.constant 0 : i32
    %c0_i32_0 = arith.constant 0 : i32
    return %arg0, %c0_i32 : i32, i32
  }
}

</mosaic_0001>

<bundles_post_ra>
// kernel: tpu_custom_call.1
= control target key start
LH: loop header
LB: loop body
LE: loop exit
PB: predicated region body
PF: predicated region fallthrough
CT: control target
= control target key end

     0   :  { %s2563_s0 = inlined_call_operand.vmem [shape: s32[16], index: 0, kind: input, shape index: {}]   ;;  %s2564_s1 = inlined_call_operand.vmem [shape: s32[16,1], index: 1, kind: input, shape index: {}]   ;;  %s2565_s2 = inlined_call_operand.hbm [shape: f32[8,16,32], index: 2, kind: input, shape index: {}]   ;;  %s2566_s3 = inlined_call_operand.vmem [shape: bf16[32,96], index: 3, kind: input, shape index: {}]   ;;  %s2567_s4 = inlined_call_operand.vmem [shape: f32[1,96], index: 4, kind: input, shape index: {}]   ;;  %s2568_s5 = inlined_call_operand.hbm [shape: f32[6,16,16], index: 5, kind: input, shape index: {}]   ;;  %s2569_s6 = inlined_call_operand.vmem [shape: f32[6,1,16], index: 6, kind: input, shape index: {}]   ;;  %s2570_s7 = inlined_call_operand.hbm [shape: f32[8,16,32], index: 7, kind: output, shape index: {0}]   ;;  %s2571_s8 = inlined_call_operand.hbm [shape: f32[16,32], index: 8, kind: output, shape index: {1}]  }
   0x1   :  { %2579 = sst [smem:[#allocation19_spill]] %s2565_s2  ;;  %s14_s29 = sshll.u32 %s2563_s0, 4  ;;  %s15_s29 = int_to_ptr.vmem [resolvable:$true] %s14_s29 }
   0x2   :  { %2580 = sst [smem:[#allocation20_spill]] %s2568_s5  ;;  %s1779_s30 = scalar_lea.vmem %s15_s29, 16 }
   0x3   :  { %p1780_p0 = scmp.ne.s32.totalorder %s15_s29, %s1779_s30  ;;  %p1784_p1 = scmp.lt.s32.totalorder %s15_s29, %s15_s29 }
   0x4   :  { %p1785_p2 = scmp.lt.s32.totalorder %s1779_s30, %s1779_s30 }
   0x6   :  { %p1786_p3 = por %p1785_p2, %p1784_p1 }
   0x8   :  { %p1787_p4 = pnand %p1786_p3, %p1780_p0 }
   0xa   :  { %1790 = shalt.err (!%p1787_p4)  }
   0xb   :  { %s1995_s9 = smov [#allocation4]  }
   0xc   :  { %17 = dma.vmem_to_smem %s15_s29, 16, %s1995_s9, [#allocation3] }
   0xd   :  { %1941 = dma.done.wait [#allocation3], 16 }
   0xe   :  { %1942 = vsyncadd [#allocation3], 4294967280 }
   0xf   :  { %19 = sfence }
  0x10   :  { %20 = vsyncpa [#allocation6], 0 }
  0x11   :  { %22 = vsyncpa [#allocation6 + $0x1], 0 }
  0x12   :  { %23 = vsyncpa [#allocation9], 0 }
  0x13   :  { %24 = vsyncpa [#allocation7], 0 }
  0x14   :  { %26 = vsyncpa [#allocation7 + $0x1], 0 }
  0x15   :  { %27 = vsyncpa [#allocation12], 0 }
  0x16   :  { %29 = vsyncpa [#allocation12 + $0x1], 0  ;;  %s2066_s0 = smov 0   ;;  %s2068_s10 = smov 0  }
  0x17   :  { %s2070_s11 = smov 0   ;;  %s2072_s12 = smov 0  }
  0x18 LB: > { %s2087_s13 = sadd.s32 4294967295, %s1973_s12   ;;  %s1472_s14 = sadd.s32 4294967294, %s1973_s12   ;;  %s1973_s12 = sphi %s2072_s12, %s2611_s12   ;;  %s1969_s11 = sphi %s2070_s11, %s2610_s11   ;;  %s1965_s10 = sphi %s2068_s10, %s2609_s10   ;;  %s1961_s0 = sphi %s2066_s0, %s2608_s0  }
  0x19   : > { %s2091_s15 = sadd.s32 1, %s1973_s12   ;;  %s68_s16 = sadd.s32 1, %s1969_s11 }
  0x1a   : > { %s65_s17 = ssub.s32 %s1973_s12, %s2091_s15  ;;  %p75_p5 = scmp.ne.s32.totalorder %s1969_s11, %s1965_s10 }
  0x1b   : > { %p66_p6 = scmp.eq.s32.totalorder %s65_s17, 0  ;;  %p76_p7 = scmp.eq.s32.totalorder %s1973_s12, 0 }
  0x1c   : > { %p81_p8 = scmp.ne.s32.totalorder %s1965_s10, %s1961_s0  ;;  %p2572_p9 = scmp.eq.s32.totalorder %s2087_s13, 0 }
  0x1d   : > { %s2103_s18 = scalar_select %p66_p6, %s1969_s11, %s68_s16  }
  0x1e   : > { %p2105_p10 = por %p76_p7, %p75_p5  ;;  %p2111_p11 = por %p2572_p9, %p81_p8 }
  0x1f   : > { %2581 = sst [smem:[#allocation18_spill]] %s2103_s18  ;;  %p189_p12 = scmp.eq.s32.totalorder %s2087_s13, 1 }
  0x20   : > { %s2582_s19 = scalar_select %p2105_p10, 1, 0 }
  0x21   : > { %s2583_s20 = scalar_select %p2111_p11, 1, 0 }
  0x22   : > { %p195_p13 = scmp.eq.s32.totalorder %s1472_s14, 1  ;;  %p1473_p0 = scmp.ge.s32.totalorder %s1973_s12, 1 }
  0x23   : > { %p228_p1 = scmp.lt.s32.totalorder %s1973_s12, 3  ;;  %p2118_p2 = por %p189_p12, %p75_p5 }
  0x24   : > { %p2122_p3 = por %p195_p13, %p81_p8  ;;  %s1996_s24 = smov [#allocation8]  }
  0x25   : > { %s2584_s21 = scalar_select %p2118_p2, 1, 0 }
  0x26   : > { %s2585_s22 = scalar_select %p2122_p3, 1, 0 }
  0x27   : > { %p2126_p4 = pnand %p1473_p0, %p228_p1  ;;  %s246_s25 = sshll.u32 %s1996_s24, 4  ;;  %s247_s25 = int_to_ptr.vmem [resolvable:$true] %s246_s25 }
  0x28   : > { %s270_s27 = sand.u32 1, %s1969_s11   ;;  %s2588_s5 = sld [smem:[#allocation20_spill]] }
  0x29   : > { %s2586_s23 = scalar_select %p2126_p4, 1, 0 }
  0x2a   : > { %p1643_p6 = pneg %p2126_p4 }
  0x2c   : > { %p2134_p7 = pnand %p1643_p6, %p2572_p9 }
  0x2e   : > { %s1791_s30 = scalar_lea.hbm %s2588_s5, 1536  ;;  %p1793_p13 = pneg %p2134_p7 }
  0x2f   : > { %p1792_p12 = scmp.ne.s32.totalorder %s2588_s5, %s1791_s30  ;;  %p1798_p6 = scmp.lt.u32.totalorder %s1791_s30, %s2588_s5 }
  0x31   : > { %p1794_p0 = pnand %p1793_p13, %p1792_p12 }
  0x33   : > { %p1795_p1 = pneg %p1794_p0 }
  0x35   : > { %p1800_p9 = pnand %p1798_p6, %p1795_p1 }
  0x37   : > { %1803 = shalt.err (!%p1800_p9)
}
  0x38   : > { %s1804_s24 = scalar_lea.vmem %s247_s25, 1536  ;;  %p1812_p2 = scmp.lt.s32.totalorder %s247_s25, %s247_s25 }
  0x39   : > { %p1805_p5 = scmp.ne.s32.totalorder %s247_s25, %s1804_s24  ;;  %p1813_p11 = scmp.lt.s32.totalorder %s1804_s24, %s1804_s24 }
  0x3b   : > { %p1807_p8 = pnand %p1805_p5, %p1793_p13  ;;  %p1814_p4 = por %p1813_p11, %p1812_p2 }
  0x3d   : > { %p1808_p3 = pneg %p1807_p8 }
  0x3f   : > { %p1815_p10 = pnand %p1814_p4, %p1808_p3 }
  0x41   : > { %1818 = shalt.err (!%p1815_p10)
}
  0x42   : > { %s2576_s28 = smov 128   ;;  %s2577_s29 = smov 8  }
  0x43   : > { %1646 = dma.hbm_to_vmem [thread:$0]  (!%p2134_p7), %s2588_s5, 1536, %s247_s25, [#allocation9], %s2576_s28, %s2576_s28, %s2577_s29  }
  0x44   : > { %p2589_p9 = scmp.ne.s32.totalorder %s2582_s19, 0  ;;  %p2590_p5 = scmp.lt.s32.totalorder %s1973_s12, 2 }
  0x45   : > { %s1476_s16 = sshll.u32 %s270_s27, 6  ;;  %s1477_s17 = sshll.u32 %s1973_s12, 7 }
  0x46   : > { %p2164_p8 = pnand %p2590_p5, %p2589_p9  ;;  %s2592_s2 = sld [smem:[#allocation19_spill]] }
  0x47   : > { %s274_s25 = scalar_lea.vmem [#allocation5], %s1476_s16  ;;  %s2176_s30 = scalar_lea.sflag [#allocation6], %s270_s27 }
  0x48   : > { %s280_s19 = sshll.u32 %s274_s25, 4  ;;  %p1821_p11 = pneg %p2164_p8  ;;  %s2174_s19 = int_to_ptr.vmem [resolvable:$true] %s280_s19 }
  0x4c   : > { %s2172_s26 = scalar_lea.hbm %s2592_s2, %s1477_s17  ;;  %s1824_s24 = scalar_lea.hbm %s2592_s2, 2048 }
  0x4d   : > { %s1819_s9 = scalar_lea.hbm %s2172_s26, 1024  ;;  %p1825_p4 = scmp.lt.u32.totalorder %s2172_s26, %s2592_s2 }
  0x4e   : > { %p1820_p10 = scmp.ne.s32.totalorder %s2172_s26, %s1819_s9  ;;  %p1826_p7 = scmp.lt.u32.totalorder %s1824_s24, %s1819_s9 }
  0x4f   : > { %p1828_p13 = scmp.lt.u32.totalorder %s1819_s9, %s2172_s26 }
  0x50   : > { %p1822_p2 = pnand %p1821_p11, %p1820_p10  ;;  %p1827_p12 = por %p1826_p7, %p1825_p4 }
  0x52   : > { %p1823_p3 = pneg %p1822_p2  ;;  %p1829_p0 = por %p1828_p13, %p1827_p12 }
  0x54   : > { %p1830_p1 = pnand %p1829_p0, %p1823_p3 }
  0x56   : > { %1833 = shalt.err (!%p1830_p1)
}
  0x57   : > { %s1834_s27 = scalar_lea.vmem %s2174_s19, 1024  ;;  %s1999_s16 = smov [#allocation5]  }
  0x58   : > { %p1835_p6 = scmp.ne.s32.totalorder %s2174_s19, %s1834_s27  ;;  %s1839_s25 = sshll.u32 %s1999_s16, 4  ;;  %s1840_s25 = int_to_ptr.vmem [resolvable:$false] %s1839_s25 }
  0x59   : > { %s1841_s28 = scalar_lea.vmem %s1840_s25, 2048  ;;  %p1842_p10 = scmp.lt.s32.totalorder %s2174_s19, %s1840_s25 }
  0x5a   : > { %p1837_p9 = pnand %p1835_p6, %p1821_p11  ;;  %p1843_p2 = scmp.lt.s32.totalorder %s1841_s28, %s1834_s27 }
  0x5c   : > { %p1838_p5 = pneg %p1837_p9  ;;  %p1844_p4 = por %p1843_p2, %p1842_p10 }
  0x5e   : > { %p1845_p7 = pnand %p1844_p4, %p1838_p5 }
  0x60   : > { %1848 = shalt.err (!%p1845_p7)
}
  0x61   : > { %s2000_s29 = smov 256   ;;  %s2593_s9 = smov 8  }
  0x62   : > { %s2594_s18 = smov 128   ;;  %p2595_p11 = scmp.ne.s32.totalorder %s2586_s23, 0 }
  0x63   : > { %1650 = dma.hbm_to_vmem [thread:$0]  (!%p2164_p8), %s2172_s26, 1024, %s2174_s19, %s2176_s30, %s2000_s29, %s2594_s18, %s2593_s9  }
  0x64   : > { %292 = sbr.rel (%p2595_p11) target bundleno = 1206 (0x4b6), region = 44  ;;  %s2209_s17 = sand.u32 (!%p2595_p11), 1, %s1965_s10  }
  0x65   : > { %s2578_s24 = sshll.u32 (!%p2595_p11), %s2209_s17, 6  ;;  %s295_s27 = scalar_lea.sflag (!%p2595_p11), [#allocation6], %s2209_s17 }
  0x66   : > { %s2215_s14 = scalar_lea.vmem (!%p2595_p11), [#allocation5], %s2578_s24  ;;  %p2596_p3 = scmp.ne.s32.totalorder (!%p2595_p11), %s2583_s20, 0 }
  0x6b   : > { %1944 = dma.done.wait (%p2596_p3), %s295_s27, 1024  }
  0x6c   : > { %1946 = vsyncadd (%p2596_p3), %s295_s27, 4294966272  ;;  %p2597_p8 = scmp.eq.s32.totalorder %s2087_s13, 0 }
  0x6e   : > { %1948 = dma.done.wait (%p2597_p8), [#allocation9], 1536   ;;  %p2598_p12 = pmov %p2597_p8 }
  0x6f   : > { %p342_p13 = scmp.lt.s32.totalorder %s2087_s13, 1  ;;  %s2227_s23 = sshll.u32 %s2087_s13, 3  ;;  %v1754_v1 = vld [vmem:[%s2566_s3] sm:$0xff]   ;;  %v1755_v2 = vld [vmem:[%s2566_s3 + $0x8] sm:$0xff]   ;;  %vm378_vm0 = vcmask 261120   ;;  %v389_v9 = vld [vmem:[%s2215_s14 + $0x10] sm:$0xff] }
  0x70   : > { %1950 = vsyncadd (%p2598_p12), [#allocation9], 4294965760  ;;  %s348_s26 = sld [smem:[#allocation4 + %s2227_s23]]  ;;  %s349_s20 = sadd.s32 1, %s2227_s23  ;;  %1557 = vmatprep.subr.bf16.mxu0 %v1754_v1  ;;  %1629 = vmatprep.subr.bf16.mxu1 %v1754_v1  ;;  %v387_v3 = vld [vmem:[%s2215_s14] sm:$0xff]  ;;  %v388_v4 = vld [vmem:[%s2215_s14 + $0x8] sm:$0xff] }
  0x71   : > { %s343_s19 = scalar_select %p342_p13, %s2087_s13, 1  ;;  %1558 = vmatpush3.bf16.msra.mxu0 %v1754_v1  ;;  %1631 = vmatpush3.bf16.msra.mxu1 %v1754_v1  ;;  %v391_v5 = vld [vmem:[%s2215_s14 + $0x20] sm:$0xff]  ;;  %v392_v6 = vld [vmem:[%s2215_s14 + $0x28] sm:$0xff]  ;;  %v395_v7 = vpack.c.bf16 %v388_v4, %v387_v3  ;;  %v390_v10 = vld [vmem:[%s2215_s14 + $0x18] sm:$0xff]  ;;  %v2001_v15 = vmov 0.0   ;;  %vm499_vm1 = vcmask 130048  }
  0x72   : > { %s350_s30 = sld [smem:[#allocation4 + %s349_s20]]  ;;  %s353_s16 = sadd.s32 2, %s2227_s23  ;;  %1559 = vmatprep.subr.bf16.mxu0 %v1755_v2  ;;  %1630 = vmatprep.subr.bf16.mxu1 %v1755_v2  ;;  %v397_v8 = vpack.c.bf16 %v392_v6, %v391_v5  ;;  %v393_v11 = vld [vmem:[%s2215_s14 + $0x30] sm:$0xff]  ;;  %v394_v12 = vld [vmem:[%s2215_s14 + $0x38] sm:$0xff]  ;;  %v396_v13 = vpack.c.bf16 %v390_v10, %v389_v9  ;;  %v1485_v16 = vld [vmem:[%s2567_s4] ss:$0 sm:$0xff] }
  0x73   : > { %s1483_s25 = sshll.u32 %s343_s19, 3  ;;  %s2233_s28 = sld [smem:[#allocation4 + %s353_s16]]  ;;  %1561 = vmatprep.mubr.msk.bf16.mxu0 %vm378_vm0, %v395_v7  ;;  %v398_v14 = vpack.c.bf16 %v394_v12, %v393_v11  ;;  %v2370_v10 = vmov 0.0   ;;  %v2372_v11 = vmov 0.0  }
  0x74   : > { %s345_s18 = scalar_lea.vmem %s2564_s1, %s1483_s25  ;;  %s357_s27 = sadd.s32 3, %s2227_s23  ;;  %1565 = vmatprep.mubr.msk.bf16.mxu1 %vm378_vm0, %v397_v8 }
  0x75   : > { %v2239_v0 = vld [vmem:[%s345_s18] sm:$0xff]  ;;  %s2244_s5 = sld [smem:[#allocation4 + %s357_s27]]  ;;  %s361_s20 = sadd.s32 4, %s2227_s23  ;;  %1560 = vmatpush3.bf16.msra.mxu0 %v1755_v2  ;;  %1632 = vmatpush3.bf16.msra.mxu1 %v1755_v2 }
  0x76   : > { %s1482_s25 = sshll.u32 %s2209_s17, 3  ;;  %s2258_s2 = sld [smem:[#allocation4 + %s361_s20]] }
  0x77   : > { %s365_s24 = sadd.s32 5, %s2227_s23  ;;  %s369_s9 = sadd.s32 6, %s2227_s23 }
  0x78   : > { %p351_p0 = scmp.gt.s32.totalorder %s348_s26, %s350_s30  ;;  %s366_s14 = sld [smem:[#allocation4 + %s365_s24]]  ;;  %1562 = vmatmul.mubr.msk.bf16.vlgmr.msra.gmra.mrb[0].mxu0 %vm378_vm0, %v396_v13  ;;  %1566 = vmatmul.mubr.msk.bf16.vlgmr.msra.gmra.mrb[0].mxu1 %vm378_vm0, %v398_v14 }
  0x79   : > { %s370_s18 = sld [smem:[#allocation4 + %s369_s9]]  ;;  %s373_s27 = sadd.s32 7, %s2227_s23 }
  0x7a   : > { %s2613_s26 = smov (!%p351_p0, %s348_s26), %s350_s30  ;;  %s2599_s30 = sshll.u32 %s2209_s17, 6 }
  0x7b   : > { %p355_p1 = scmp.gt.s32.totalorder %s2613_s26, %s2233_s28  ;;  %s2267_s29 = scalar_lea.vmem [#allocation10], %s2599_s30 }
  0x7c   : > { %379 = vst.msk [vmem:[%s2267_s29] sm:$0xff] %vm378_vm0, %v2001_v15  ;;  %380 = vst.msk [vmem:[%s2267_s29 + $0x8] sm:$0xff] %vm378_vm0, %v2001_v15  ;;  %s374_s20 = sld [smem:[#allocation4 + %s373_s27]]  ;;  %s2003_s23 = smov 96  }
  0x7d   : > { %381 = vst.msk [vmem:[%s2267_s29 + $0x10] sm:$0xff] %vm378_vm0, %v2001_v15  ;;  %382 = vst.msk [vmem:[%s2267_s29 + $0x18] sm:$0xff] %vm378_vm0, %v2001_v15  ;;  %s2615_s26 = smov (!%p355_p1, %s2613_s26), %s2233_s28  ;;  %s2004_s16 = smov 80  }
  0x7e   : > { %383 = vst.msk [vmem:[%s2267_s29 + $0x20] sm:$0xff] %vm378_vm0, %v2001_v15  ;;  %384 = vst.msk [vmem:[%s2267_s29 + $0x28] sm:$0xff] %vm378_vm0, %v2001_v15  ;;  %p359_p6 = scmp.gt.s32.totalorder %s2615_s26, %s2244_s5  ;;  %s2006_s24 = smov 48  }
  0x7f   : > { %385 = vst.msk [vmem:[%s2267_s29 + $0x30] sm:$0xff] %vm378_vm0, %v2001_v15  ;;  %386 = vst.msk [vmem:[%s2267_s29 + $0x38] sm:$0xff] %vm378_vm0, %v2001_v15  ;;  %s2367_s30 = scalar_lea.vmem [#allocation11], %s1482_s25 }
  0x80   : > { %s2617_s26 = smov (!%p359_p6, %s2615_s26), %s2244_s5  ;;  %s2002_s5 = smov 112  }
  0x81   : > { %p363_p9 = scmp.gt.s32.totalorder %s2617_s26, %s2258_s2 }
  0x83   : > { %s2619_s26 = smov (!%p363_p9, %s2617_s26), %s2258_s2  ;;  %s2005_s2 = smov 64  }
  0x84   : > { %p367_p5 = scmp.gt.s32.totalorder %s2619_s26, %s366_s14 }
  0x86   : > { %s2621_s26 = smov (!%p367_p5, %s2619_s26), %s366_s14 }
  0x87   : > { %p371_p10 = scmp.gt.s32.totalorder %s2621_s26, %s370_s18 }
  0x89   : > { %s2623_s26 = smov (!%p371_p10, %s2621_s26), %s370_s18 }
  0x8a   : > { %p375_p2 = scmp.gt.s32.totalorder %s2623_s26, %s374_s20 }
  0x8c   : > { %s2625_s26 = smov (!%p375_p2, %s2623_s26), %s374_s20 }
  0x8d   : > { %p1492_p4 = scmp.le.s32.totalorder %s2625_s26, 0 }
  0x8e   : > { %v2374_v12 = vmov (!%p1492_p4), 0.0   ;;  %v2376_v13 = vmov (!%p1492_p4), 0.0   ;;  %s2378_s14 = smov (!%p1492_p4), 0  }
 0x14b   : > { %v1563_v17 = vpop.f32.mrb[0].mxu0  ;;  %v1567_v18 = vpop.f32.mrb[0].mxu1 }
 0x14c   : > { %v477_v19 = vadd.f32 %v1563_v17, %v1485_v16  ;;  %v2301_v20 = vadd.f32 %v1567_v18, %v1485_v16  ;;  %v468_v21 = vpop.f32.mrb[1].mxu0  ;;  %v484_v22 = vpop.f32.mrb[1].mxu1 }
 0x14d   : > { %v469_v23 = vadd.f32 %v1485_v16, %v468_v21  ;;  %v485_v24 = vadd.f32 %v1485_v16, %v484_v22  ;;  %v1564_v25 = vpop.f32.mrb[2].mxu0  ;;  %v1568_v26 = vpop.f32.mrb[2].mxu1 }
 0x14e   : > { %502 = vst.msk [vmem:[#allocation2 + $0x10] sm:$0xff] %vm499_vm1, %v477_v19  ;;  %506 = vst.msk [vmem:[#allocation2 + $0x30] sm:$0xff] %vm499_vm1, %v2301_v20  ;;  %v480_v27 = vadd.f32 %v1564_v25, %v1485_v16  ;;  %v496_v28 = vadd.f32 %v1568_v26, %v1485_v16  ;;  %528 = vrot.lane.b32.xlu0 %v2301_v20, %s2002_s5  ;;  %v487_v29 = vpop.f32.mrb[3].mxu1  ;;  %520 = vrot.lane.b32.xlu1 %v477_v19, %s2002_s5  ;;  %v471_v30 = vpop.f32.mrb[3].mxu0 }
 0x14f   : > { %500 = vst.msk [vmem:[#allocation2] sm:$0xff] %vm499_vm1, %v469_v23  ;;  %504 = vst.msk [vmem:[#allocation2 + $0x20] sm:$0xff] %vm499_vm1, %v485_v24  ;;  %v488_v31 = vadd.f32 %v1485_v16, %v487_v29  ;;  %v472_v32 = vadd.f32 %v1485_v16, %v471_v30 }
 0x150   : > { %503 = vst.msk [vmem:[#allocation2 + $0x18] sm:$0xff] %vm499_vm1, %v480_v27  ;;  %507 = vst.msk [vmem:[#allocation2 + $0x38] sm:$0xff] %vm499_vm1, %v496_v28 }
 0x151   : > { %505 = vst.msk [vmem:[#allocation2 + $0x28] sm:$0xff] %vm499_vm1, %v488_v31  ;;  %501 = vst.msk [vmem:[#allocation2 + $0x8] sm:$0xff] %vm499_vm1, %v472_v32 }
 0x152   : > { %553 = vrot.lane.b32.xlu0 %v477_v19, %s2003_s23  ;;  %522 = vrot.lane.b32.xlu1 %v480_v27, %s2002_s5 }
 0x156   : > { %561 = vrot.lane.b32.xlu0 %v2301_v20, %s2003_s23  ;;  %530 = vrot.lane.b32.xlu1 %v496_v28, %s2002_s5 }
 0x15a   : > { %586 = vrot.lane.b32.xlu0 %v477_v19, %s2004_s16  ;;  %555 = vrot.lane.b32.xlu1 %v480_v27, %s2003_s23 }
 0x15e   : > { %594 = vrot.lane.b32.xlu0 %v2301_v20, %s2004_s16  ;;  %563 = vrot.lane.b32.xlu1 %v496_v28, %s2003_s23 }
 0x162   : > { %619 = vrot.lane.b32.xlu0 %v477_v19, %s2005_s2  ;;  %588 = vrot.lane.b32.xlu1 %v480_v27, %s2004_s16 }
 0x166   : > { %627 = vrot.lane.b32.xlu0 %v2301_v20, %s2005_s2  ;;  %596 = vrot.lane.b32.xlu1 %v496_v28, %s2004_s16 }
 0x16a   : > { %652 = vrot.lane.b32.xlu0 %v477_v19, %s2006_s24  ;;  %621 = vrot.lane.b32.xlu1 %v480_v27, %s2005_s2 }
 0x16e   : > { %629 = vrot.lane.b32.xlu1 %v496_v28, %s2005_s2  ;;  %516 = vrot.lane.b32.xlu0 %v469_v23, %s2002_s5 }
 0x172   : > { %654 = vrot.lane.b32.xlu1 %v480_v27, %s2006_s24  ;;  %524 = vrot.lane.b32.xlu0 %v485_v24, %s2002_s5 }
 0x176   : > { %526 = vrot.lane.b32.xlu1 %v488_v31, %s2002_s5  ;;  %549 = vrot.lane.b32.xlu0 %v469_v23, %s2003_s23 }
 0x17a   : > { %551 = vrot.lane.b32.xlu1 %v472_v32, %s2003_s23  ;;  %557 = vrot.lane.b32.xlu0 %v485_v24, %s2003_s23 }
 0x17e   : > { %559 = vrot.lane.b32.xlu1 %v488_v31, %s2003_s23  ;;  %582 = vrot.lane.b32.xlu0 %v469_v23, %s2004_s16 }
 0x182   : > { %584 = vrot.lane.b32.xlu1 %v472_v32, %s2004_s16  ;;  %590 = vrot.lane.b32.xlu0 %v485_v24, %s2004_s16 }
 0x186   : > { %592 = vrot.lane.b32.xlu1 %v488_v31, %s2004_s16  ;;  %615 = vrot.lane.b32.xlu0 %v469_v23, %s2005_s2 }
 0x18a   : > { %617 = vrot.lane.b32.xlu1 %v472_v32, %s2005_s2  ;;  %623 = vrot.lane.b32.xlu0 %v485_v24, %s2005_s2 }
 0x18e   : > { %625 = vrot.lane.b32.xlu1 %v488_v31, %s2005_s2  ;;  %648 = vrot.lane.b32.xlu0 %v469_v23, %s2006_s24 }
 0x192   : > { %650 = vrot.lane.b32.xlu1 %v472_v32, %s2006_s24  ;;  %656 = vrot.lane.b32.xlu0 %v485_v24, %s2006_s24 }
 0x196   : > { %658 = vrot.lane.b32.xlu1 %v488_v31, %s2006_s24  ;;  %518 = vrot.lane.b32.xlu0 %v472_v32, %s2002_s5 }
 0x19a   : > { %662 = vrot.lane.b32.xlu1 %v496_v28, %s2006_s24  ;;  %660 = vrot.lane.b32.xlu0 %v2301_v20, %s2006_s24 }
 0x1c0   : > { %v529_v33 = vpop.permute.xlu0 %528  ;;  %v521_v34 = vpop.permute.xlu1 %520 }
 0x1c1   : > { %547 = vst.msk [vmem:[#allocation2 + $0x70] sm:$0xff] %vm499_vm1, %v529_v33  ;;  %543 = vst.msk [vmem:[#allocation2 + $0x50] sm:$0xff] %vm499_vm1, %v521_v34 }
 0x1c4   : > { %v554_v35 = vpop.permute.xlu0 %553  ;;  %v523_v36 = vpop.permute.xlu1 %522 }
 0x1c5   : > { %576 = vst.msk [vmem:[#allocation2 + $0x90] sm:$0xff] %vm499_vm1, %v554_v35  ;;  %544 = vst.msk [vmem:[#allocation2 + $0x58] sm:$0xff] %vm499_vm1, %v523_v36 }
 0x1c8   : > { %v562_v37 = vpop.permute.xlu0 %561  ;;  %v531_v38 = vpop.permute.xlu1 %530 }
 0x1c9   : > { %580 = vst.msk [vmem:[#allocation2 + $0xb0] sm:$0xff] %vm499_vm1, %v562_v37  ;;  %548 = vst.msk [vmem:[#allocation2 + $0x78] sm:$0xff] %vm499_vm1, %v531_v38 }
 0x1cc   : > { %v587_v39 = vpop.permute.xlu0 %586  ;;  %v556_v40 = vpop.permute.xlu1 %555 }
 0x1cd   : > { %609 = vst.msk [vmem:[#allocation2 + $0xd0] sm:$0xff] %vm499_vm1, %v587_v39  ;;  %577 = vst.msk [vmem:[#allocation2 + $0x98] sm:$0xff] %vm499_vm1, %v556_v40 }
 0x1d0   : > { %v595_v41 = vpop.permute.xlu0 %594  ;;  %v564_v42 = vpop.permute.xlu1 %563 }
 0x1d1   : > { %613 = vst.msk [vmem:[#allocation2 + $0xf0] sm:$0xff] %vm499_vm1, %v595_v41  ;;  %581 = vst.msk [vmem:[#allocation2 + $0xb8] sm:$0xff] %vm499_vm1, %v564_v42 }
 0x1d4   : > { %v620_v43 = vpop.permute.xlu0 %619  ;;  %v589_v44 = vpop.permute.xlu1 %588 }
 0x1d5   : > { %642 = vst.msk [vmem:[#allocation2 + $0x110] sm:$0xff] %vm499_vm1, %v620_v43  ;;  %610 = vst.msk [vmem:[#allocation2 + $0xd8] sm:$0xff] %vm499_vm1, %v589_v44 }
 0x1d8   : > { %v628_v45 = vpop.permute.xlu0 %627  ;;  %v597_v46 = vpop.permute.xlu1 %596 }
 0x1d9   : > { %646 = vst.msk [vmem:[#allocation2 + $0x130] sm:$0xff] %vm499_vm1, %v628_v45  ;;  %614 = vst.msk [vmem:[#allocation2 + $0xf8] sm:$0xff] %vm499_vm1, %v597_v46 }
 0x1dc   : > { %v653_v47 = vpop.permute.xlu0 %652  ;;  %v622_v48 = vpop.permute.xlu1 %621 }
 0x1dd   : > { %675 = vst.msk [vmem:[#allocation2 + $0x150] sm:$0xff] %vm499_vm1, %v653_v47  ;;  %643 = vst.msk [vmem:[#allocation2 + $0x118] sm:$0xff] %vm499_vm1, %v622_v48 }
 0x1e0   : > { %v630_v49 = vpop.permute.xlu1 %629  ;;  %v517_v50 = vpop.permute.xlu0 %516 }
 0x1e1   : > { %647 = vst.msk [vmem:[#allocation2 + $0x138] sm:$0xff] %vm499_vm1, %v630_v49  ;;  %541 = vst.msk [vmem:[#allocation2 + $0x40] sm:$0xff] %vm499_vm1, %v517_v50 }
 0x1e4   : > { %v655_v51 = vpop.permute.xlu1 %654  ;;  %v525_v52 = vpop.permute.xlu0 %524 }
 0x1e5   : > { %676 = vst.msk [vmem:[#allocation2 + $0x158] sm:$0xff] %vm499_vm1, %v655_v51  ;;  %545 = vst.msk [vmem:[#allocation2 + $0x60] sm:$0xff] %vm499_vm1, %v525_v52 }
 0x1e8   : > { %v527_v53 = vpop.permute.xlu1 %526  ;;  %v550_v54 = vpop.permute.xlu0 %549 }
 0x1e9   : > { %546 = vst.msk [vmem:[#allocation2 + $0x68] sm:$0xff] %vm499_vm1, %v527_v53  ;;  %574 = vst.msk [vmem:[#allocation2 + $0x80] sm:$0xff] %vm499_vm1, %v550_v54 }
 0x1ec   : > { %v552_v55 = vpop.permute.xlu1 %551  ;;  %v558_v56 = vpop.permute.xlu0 %557 }
 0x1ed   : > { %575 = vst.msk [vmem:[#allocation2 + $0x88] sm:$0xff] %vm499_vm1, %v552_v55  ;;  %578 = vst.msk [vmem:[#allocation2 + $0xa0] sm:$0xff] %vm499_vm1, %v558_v56 }
 0x1f0   : > { %v560_v57 = vpop.permute.xlu1 %559  ;;  %v583_v58 = vpop.permute.xlu0 %582 }
 0x1f1   : > { %579 = vst.msk [vmem:[#allocation2 + $0xa8] sm:$0xff] %vm499_vm1, %v560_v57  ;;  %607 = vst.msk [vmem:[#allocation2 + $0xc0] sm:$0xff] %vm499_vm1, %v583_v58 }
 0x1f4   : > { %v585_v59 = vpop.permute.xlu1 %584  ;;  %v591_v60 = vpop.permute.xlu0 %590 }
 0x1f5   : > { %608 = vst.msk [vmem:[#allocation2 + $0xc8] sm:$0xff] %vm499_vm1, %v585_v59  ;;  %611 = vst.msk [vmem:[#allocation2 + $0xe0] sm:$0xff] %vm499_vm1, %v591_v60 }
 0x1f8   : > { %v593_v61 = vpop.permute.xlu1 %592  ;;  %v616_v62 = vpop.permute.xlu0 %615 }
 0x1f9   : > { %612 = vst.msk [vmem:[#allocation2 + $0xe8] sm:$0xff] %vm499_vm1, %v593_v61  ;;  %640 = vst.msk [vmem:[#allocation2 + $0x100] sm:$0xff] %vm499_vm1, %v616_v62 }
 0x1fc   : > { %v618_v63 = vpop.permute.xlu1 %617  ;;  %v624_v1 = vpop.permute.xlu0 %623 }
 0x1fd   : > { %641 = vst.msk [vmem:[#allocation2 + $0x108] sm:$0xff] %vm499_vm1, %v618_v63  ;;  %644 = vst.msk [vmem:[#allocation2 + $0x120] sm:$0xff] %vm499_vm1, %v624_v1 }
 0x200   : > { %v626_v2 = vpop.permute.xlu1 %625  ;;  %v649_v3 = vpop.permute.xlu0 %648 }
 0x201   : > { %645 = vst.msk [vmem:[#allocation2 + $0x128] sm:$0xff] %vm499_vm1, %v626_v2  ;;  %673 = vst.msk [vmem:[#allocation2 + $0x140] sm:$0xff] %vm499_vm1, %v649_v3 }
 0x204   : > { %v651_v4 = vpop.permute.xlu1 %650  ;;  %v657_v5 = vpop.permute.xlu0 %656 }
 0x205   : > { %674 = vst.msk [vmem:[#allocation2 + $0x148] sm:$0xff] %vm499_vm1, %v651_v4  ;;  %677 = vst.msk [vmem:[#allocation2 + $0x160] sm:$0xff] %vm499_vm1, %v657_v5 }
 0x207   : > { %1417 = sbr.rel (%p1492_p4) target bundleno = 915 (0x393), region = 137 }
 0x208   : > { %v659_v6 = vpop.permute.xlu1 %658  ;;  %v519_v7 = vpop.permute.xlu0 %518 }
 0x209   : > { %678 = vst.msk [vmem:[#allocation2 + $0x168] sm:$0xff] %vm499_vm1, %v659_v6  ;;  %542 = vst.msk [vmem:[#allocation2 + $0x48] sm:$0xff] %vm499_vm1, %v519_v7 }
 0x20c   : > { %v663_v8 = vpop.permute.xlu1 %662  ;;  %v661_v9 = vpop.permute.xlu0 %660 }
 0x20d   : > { %680 = vst.msk [vmem:[#allocation2 + $0x178] sm:$0xff] %vm499_vm1, %v663_v8  ;;  %679 = vst.msk [vmem:[#allocation2 + $0x170] sm:$0xff] %vm499_vm1, %v661_v9 }
 0x20e LB: >> { %v700_v14 = vld [vmem:[#allocation8] sm:$0xff]  ;;  %v701_v15 = vld [vmem:[#allocation8 + $0x8] sm:$0xff]  ;;  %v783_v16 = vld [vmem:[#allocation8 + $0x10] sm:$0xff]  ;;  %v2007_v17 = vmov 0.0|0.0   ;;  %s1508_s25 = sadd.s32 4294967295, %s2625_s26  ;;  %vm2008_vm2 = vmmov 0   ;;  %v689_v32 = vstv %s1985_s14  ;;  %s1985_s14 = sphi %s2378_s14, %s684_s14   ;;  %v1981_v13 = vphi %v2376_v13, %v2601_v13   ;;  %v1977_v12 = vphi %v2374_v12, %v2600_v12  }
 0x20f   : >> { %1611 = vmatprep.subr.bf16.mxu0 %v2007_v17  ;;  %1614 = vmatprep.subr.bf16.mxu1 %v2007_v17  ;;  %v1612_v18 = vpack.c.bf16 %v701_v15, %v700_v14  ;;  %v784_v19 = vld [vmem:[#allocation8 + $0x18] sm:$0xff]  ;;  %v989_v20 = vld [vmem:[#allocation8 + $0x30] sm:$0xff]  ;;  %v2009_v23 = vmov 0.0   ;;  %v864_v24 = vld [vmem:[#allocation8 + $0x20] sm:$0xff]  ;;  %s2393_s9 = ssub.s32 %s1508_s25, %s1985_s14  ;;  %v2010_v27 = vmov 0   ;;  %vm690_vm4 = vcmp.lt.s32.totalorder %v689_v32, %v2239_v0  ;;  %s1493_s18 = sshll.u32 %s1985_s14, 3 }
 0x210   : >> { %v990_v21 = vld [vmem:[#allocation8 + $0x38] sm:$0xff]  ;;  %v1615_v22 = vpack.c.bf16 %v784_v19, %v783_v16  ;;  %1573 = vmatprep.mubr.msk.f32.mxu0 %vm2008_vm2, %v2009_v23  ;;  %1580 = vmatprep.mubr.msk.f32.mxu1 %vm2008_vm2, %v2009_v23  ;;  %v865_v25 = vld [vmem:[#allocation8 + $0x28] sm:$0xff]  ;;  %v976_v28 = vstv %s2393_s9  ;;  %v1073_v30 = vld [vmem:[#allocation8 + $0x40] sm:$0xff]  ;;  %v965_v38 = vsel %vm690_vm4, 1, %v2010_v27  ;;  %s1509_s28 = sshll.u32 %s2393_s9, 3  ;;  %s2425_s23 = scalar_lea.vmem [#allocation2], %s1493_s18 }
 0x211   : >> { %1613 = vmatpush3.bf16.msra.mxu0 %v1612_v18  ;;  %v1618_v26 = vpack.c.bf16 %v865_v25, %v864_v24  ;;  %1756 = vset.pattern.permute.xlu0 %v2010_v27  ;;  %v1621_v29 = vpack.c.bf16 %v990_v21, %v989_v20  ;;  %v1074_v31 = vld [vmem:[#allocation8 + $0x48] sm:$0xff]  ;;  %vm977_vm3 = vcmp.lt.s32.totalorder %v976_v28, %v2239_v0  ;;  %v1154_v33 = vld [vmem:[#allocation8 + $0x50] sm:$0xff]  ;;  %v1155_v34 = vld [vmem:[#allocation8 + $0x58] sm:$0xff]  ;;  %s2434_s24 = scalar_lea.vmem [#allocation2], %s1509_s28  ;;  %s2011_s2 = smov 16   ;;  %vm1267_vm7 = vcmask 261248  }
 0x212   : >> { %1616 = vmatpush3.bf16.msra.mxu1 %v1615_v22  ;;  %1617 = vmatprep.subr.bf16.mxu0 %v2007_v17  ;;  %v1255_v35 = vsel %vm977_vm3, 1, %v2010_v27  ;;  %v1624_v36 = vpack.c.bf16 %v1074_v31, %v1073_v30  ;;  %v1627_v37 = vpack.c.bf16 %v1155_v34, %v1154_v33  ;;  %v1498_v39 = vld [vmem:[%s2569_s6] ss:$0 sm:$0xff]  ;;  %v1501_v40 = vld [vmem:[%s2569_s6 + $0x1] ss:$0 sm:$0xff]  ;;  %s684_s14 = sadd.s32 1, %s1985_s14  }
 0x213   : >> { %1620 = vmatprep.subr.bf16.mxu1 %v2007_v17  ;;  %1257 = vperm.xlu0 %1756, %v1255_v35   ;;  %v1517_v50 = vld [vmem:[%s2569_s6 + $0x3] ss:$0 sm:$0xff]  ;;  %v1520_v59 = vld [vmem:[%s2569_s6 + $0x4] ss:$0 sm:$0xff]  ;;  %v1504_v15 = vld [vmem:[%s2569_s6 + $0x2] ss:$0 sm:$0xff]  ;;  %p683_p7 = scmp.ge.s32.totalorder %s684_s14, %s2625_s26 }
 0x214   : >> { %1574 = vmatmul.mubr.msk.f32.vlgmr.msra.gmra.mrb[0].mxu0 %vm499_vm1, %v1981_v13  ;;  %v693_v41 = vld [vmem:[%s2425_s23] sm:$0xff] }
 0x215   : >> { %1581 = vmatmul.mubr.msk.f32.vlgmr.msra.gmra.mrb[0].mxu1 %vm499_vm1, %v1981_v13  ;;  %1619 = vmatpush3.bf16.msra.mxu0 %v1618_v26  ;;  %v1495_v44 = vld [vmem:[%s2425_s23 + $0x40] sm:$0xff] }
 0x216   : >> { %1622 = vmatpush3.bf16.msra.mxu1 %v1621_v29  ;;  %1594 = vmatprep.mubr.msk.f32.mxu1 %vm2008_vm2, %v2009_v23  ;;  %v1511_v54 = vld [vmem:[%s2434_s24 + $0xc0] sm:$0xff] }
 0x217   : >> { %1587 = vmatprep.mubr.msk.f32.mxu0 %vm2008_vm2, %v2009_v23  ;;  %1623 = vmatprep.subr.bf16.mxu0 %v2007_v17  ;;  %v1513_v61 = vld [vmem:[%s2434_s24 + $0x100] sm:$0xff] }
 0x218   : >> { %1588 = vmatmul.mubr.msk.f32.vlgmr.msra.gmra.mrb[2].mxu0 %vm499_vm1, %v1981_v13  ;;  %1626 = vmatprep.subr.bf16.mxu1 %v2007_v17  ;;  %v1523_v19 = vld [vmem:[%s2569_s6 + $0x5] ss:$0 sm:$0xff] }
 0x219   : >> { %1595 = vmatmul.mubr.msk.f32.vlgmr.msra.gmra.mrb[2].mxu1 %vm499_vm1, %v1977_v12  ;;  %1625 = vmatpush3.bf16.msra.mxu0 %v1624_v36  ;;  %v1497_v21 = vld [vmem:[%s2425_s23 + $0x80] sm:$0xff]  ;;  %s972_s23 = scalar_lea.vmem %s2267_s29, %s1493_s18 [#allocation10] }
 0x21a   : >> { %1601 = vmatprep.mubr.msk.f32.mxu0 %vm2008_vm2, %v2009_v23  ;;  %1628 = vmatpush3.bf16.msra.mxu1 %v1627_v37  ;;  %v1515_v27 = vld [vmem:[%s2434_s24 + $0x140] sm:$0xff]  ;;  %s1266_s24 = scalar_lea.vmem %s2267_s29, %s1509_s28 [#allocation10] }
 0x21b   : >> { %1608 = vmatprep.mubr.msk.f32.mxu1 %vm2008_vm2, %v2009_v23  ;;  %967 = vperm.xlu0 %1756, %v965_v38  }
 0x21c   : >> { %1602 = vmatmul.mubr.msk.f32.vlgmr.msra.gmra.mrb[4].mxu0 %vm499_vm1, %v1977_v12 }
 0x21d   : >> { %1609 = vmatmul.mubr.msk.f32.vlgmr.msra.gmra.mrb[4].mxu1 %vm499_vm1, %v1977_v12 }
 0x292   : >> { %v1258_v30 = vpop.permute.xlu0 %1257 }
 0x293   : >> { %vm1259_vm6 = vcmp.eq.s32.totalorder %v1258_v30, 1 }
 0x29a   : >> { %v968_v33 = vpop.permute.xlu0 %967 }
 0x29b   : >> { %vm969_vm5 = vcmp.eq.s32.totalorder %v968_v33, 1 }
 0x2e7   : >> { %v778_v42 = vpop.f32.mrb[0].mxu0 }
 0x2e8   : >> { %v779_v43 = vadd.f32 %v1498_v39, %v778_v42  ;;  %v859_v45 = vpop.f32.mrb[0].mxu1  ;;  %v1575_v46 = vpop.f32.mrb[1].mxu0 }
 0x2e9   : >> { %v860_v47 = vadd.f32 %v1501_v40, %v859_v45  ;;  %v1582_v48 = vpop.f32.mrb[1].mxu1 }
 0x2ea   : >> { %v944_v49 = vadd.f32 %v779_v43, %v693_v41 }
 0x2eb   : >> { %v951_v51 = vadd.f32 %v1495_v44, %v860_v47  ;;  %v940_v52 = vpop.f32.mrb[2].mxu0 }
 0x2ec   : >> { %v1506_v53 = vmul.f32 -1.442695, %v944_v49  ;;  %v1068_v55 = vpop.f32.mrb[2].mxu1  ;;  %v1589_v56 = vpop.f32.mrb[3].mxu0  ;;  %v941_v18 = vadd.f32 %v1504_v15, %v940_v52 }
 0x2ed   : >> { %v1069_v57 = vadd.f32 %v1517_v50, %v1068_v55  ;;  %v1596_v58 = vpop.f32.mrb[3].mxu1  ;;  %v1507_v3 = vmul.f32 -1.442695, %v951_v51 }
 0x2ee   : >> { %1757 = vpow2.f32 %v1506_v53 }
 0x2ef   : >> { %v1234_v60 = vadd.f32 %v1511_v54, %v1069_v57  ;;  %v1149_v62 = vpop.f32.mrb[4].mxu0 }
 0x2f0   : >> { %v1150_v63 = vadd.f32 %v1520_v59, %v1149_v62  ;;  %v1603_v1 = vpop.f32.mrb[5].mxu0  ;;  %v1230_v2 = vpop.f32.mrb[4].mxu1 }
 0x2f1   : >> { %v1525_v4 = vmul.f32 -1.442695, %v1234_v60  ;;  %v1610_v5 = vpop.f32.mrb[5].mxu1  ;;  %v1231_v24 = vadd.f32 %v1523_v19, %v1230_v2 }
 0x2f2   : >> { %v1241_v6 = vadd.f32 %v1513_v61, %v1150_v63 }
 0x2f3   : >> { %1759 = vpow2.f32 %v1525_v4 }
 0x2f4   : >> { %v1526_v7 = vmul.f32 -1.442695, %v1241_v6  ;;  %1761 = vpow2.f32 %v1507_v3 }
 0x2f6   : >> { %1763 = vpow2.f32 %v1526_v7 }
 0x2f8   : >> { %v1758_v8 = vpop.eup %1757 }
 0x2f9   : >> { %v948_v9 = vadd.f32 1.0, %v1758_v8 }
 0x2fb   : >> { %1765 = vrcp.f32 %v948_v9 }
 0x2fd   : >> { %v1760_v10 = vpop.eup %1759 }
 0x2fe   : >> { %v1238_v11 = vadd.f32 1.0, %v1760_v10  ;;  %v1762_v14 = vpop.eup %1761 }
 0x2ff   : >> { %v955_v17 = vadd.f32 1.0, %v1762_v14 }
 0x300   : >> { %1767 = vrcp.f32 %v1238_v11  ;;  %v1764_v16 = vpop.eup %1763 }
 0x301   : >> { %v1245_v22 = vadd.f32 1.0, %v1764_v16  ;;  %1769 = vrcp.f32 %v955_v17 }
 0x303   : >> { %1771 = vrcp.f32 %v1245_v22 }
 0x305   : >> { %v1766_v20 = vpop.eup %1765 }
 0x306   : >> { %v958_v23 = vmul.f32 %v1766_v20, %v941_v18 }
 0x308   : >> { %v959_v25 = vadd.f32 %v1497_v21, %v958_v23 }
 0x30a   : >> { %v1768_v26 = vpop.eup %1767  ;;  %1773 = vtanh.f32 %v959_v25 }
 0x30b   : >> { %v1248_v28 = vmul.f32 %v1768_v26, %v1231_v24  ;;  %v1770_v31 = vpop.eup %1769 }
 0x30c   : >> { %v961_v34 = vsub.f32 1.0, %v1770_v31  ;;  %v963_v37 = vmul.f32 %v1981_v13, %v1770_v31 }
 0x30d   : >> { %v1249_v29 = vadd.f32 %v1515_v27, %v1248_v28  ;;  %v1772_v32 = vpop.eup %1771 }
 0x30e   : >> { %v1251_v38 = vsub.f32 1.0, %v1772_v32  ;;  %v1253_v44 = vmul.f32 %v1977_v12, %v1772_v32 }
 0x30f   : >> { %1775 = vtanh.f32 %v1249_v29 }
 0x314   : >> { %v1774_v35 = vpop.eup %1773 }
 0x315   : >> { %v962_v36 = vmul.f32 %v1774_v35, %v961_v34 }
 0x317   : >> { %v964_v39 = vadd.f32 %v963_v37, %v962_v36 }
 0x319   : >> { %v1776_v40 = vpop.eup %1775  ;;  %v970_v41 = vsel %vm969_vm5, %v964_v39, %v1981_v13   ;;  %v971_v42 = vsel %vm969_vm5, %v964_v39, 0.0 }
 0x31a   : >> { %973 = vst.msk [vmem:[%s972_s23] sm:$0xff] %vm499_vm1, %v971_v42  ;;  %v1252_v43 = vmul.f32 %v1776_v40, %v1251_v38  ;;  %v2601_v13 = vmov %v970_v41  ;;  %v2603_v11 = vmov (%p683_p7), %v970_v41 }
 0x31c   : >> { %v1254_v45 = vadd.f32 %v1253_v44, %v1252_v43 }
 0x31e   : >> { %v1261_v46 = vsel %vm1259_vm6, %v1254_v45, 0.0  ;;  %v1260_v47 = vsel %vm1259_vm6, %v1254_v45, %v1977_v12  }
 0x31f   : >> { %1263 = vrot.lane.b32.xlu1 %v1261_v46, %s2011_s2  ;;  %v2600_v12 = vmov %v1260_v47  ;;  %v2602_v10 = vmov (%p683_p7), %v1260_v47 }
 0x38c   : > { %686 = sbr.rel (!%p683_p7) target bundleno = 526 (0x20e), region = 143 }
 0x391   : >> { %v1264_v48 = vpop.permute.xlu1 %1263 }
 0x392   : >> { %1268 = vst.msk [vmem:[%s1266_s24] sm:$0xff] %vm1267_vm7, %v1264_v48 }
 0x393 PF: > { %s2012_s9 = smov 16   ;;  %s1529_s26 = sshll.u32 %s2087_s13, 7  ;;  %v1993_v11 = vphi %v2372_v11, %v2603_v11   ;;  %v1989_v10 = vphi %v2370_v10, %v2602_v10  }
 0x394   : > { %1270 = vrot.lane.b32.xlu0 %v1989_v10, %s2012_s9  ;;  %s2482_s28 = scalar_lea.hbm %s2570_s7, %s1529_s26  ;;  %s1300_s25 = sshll.u32 %s2267_s29, 4  ;;  %s2485_s25 = int_to_ptr.vmem [resolvable:$true] %s1300_s25 }
 0x395   : > { %s1283_s27 = scalar_lea.sflag [#allocation7], %s2209_s17  ;;  %s1849_s20 = scalar_lea.vmem %s2485_s25, 1024 }
 0x396   : > { %p1850_p11 = scmp.ne.s32.totalorder %s2485_s25, %s1849_s20  ;;  %p2604_p3 = scmp.ne.s32.totalorder %s2584_s21, 0 }
 0x397   : > { %s2013_s19 = smov [#allocation10]  }
 0x398   : > { %p1851_p8 = pnand %p1850_p11, %p2604_p3  ;;  %s1853_s5 = sshll.u32 %s2013_s19, 4  ;;  %s1854_s5 = int_to_ptr.vmem [resolvable:$false] %s1853_s5 }
 0x399   : > { %s1855_s16 = scalar_lea.vmem %s1854_s5, 2048  ;;  %p1856_p13 = scmp.lt.s32.totalorder %s2485_s25, %s1854_s5 }
 0x39a   : > { %p1852_p12 = pneg %p1851_p8  ;;  %p1857_p0 = scmp.lt.s32.totalorder %s1855_s16, %s1849_s20 }
 0x39c   : > { %p1858_p1 = por %p1857_p0, %p1856_p13 }
 0x39e   : > { %p1859_p6 = pnand %p1858_p1, %p1852_p12 }
 0x406   : > { %v1271_v13 = vpop.permute.xlu0 %1270 }
 0x407   : > { %v1273_v49 = vsel %vm499_vm1, %v1993_v11, %v1271_v13 }
 0x408   : > { %v1274_v0 = vmul.f32 %v1273_v49, %v1273_v49 }
 0x40a   : > { %v1275_v12 = vsel %vm378_vm0, %v1274_v0, 0.0 }
 0x40b   : > { %1276 = vadd.xlane.f32.xlu0 %v1275_v12 }
 0x40c   : > { %1862 = shalt.err (!%p1859_p6)
}
 0x40d   : > { %s1863_s29 = scalar_lea.hbm %s2482_s28, 1024  ;;  %s1867_s24 = scalar_lea.hbm %s2570_s7, 2048 }
 0x40e   : > { %p1864_p9 = scmp.ne.s32.totalorder %s2482_s28, %s1863_s29  ;;  %p1868_p2 = scmp.lt.u32.totalorder %s2482_s28, %s2570_s7 }
 0x40f   : > { %p1869_p4 = scmp.lt.u32.totalorder %s1867_s24, %s1863_s29  ;;  %p1871_p11 = scmp.lt.u32.totalorder %s1863_s29, %s2482_s28 }
 0x410   : > { %p1865_p5 = pnand %p1864_p9, %p2604_p3 }
 0x411   : > { %p1870_p7 = por %p1869_p4, %p1868_p2 }
 0x412   : > { %p1866_p10 = pneg %p1865_p5 }
 0x413   : > { %p1872_p8 = por %p1871_p11, %p1870_p7 }
 0x415   : > { %p1873_p12 = pnand %p1872_p8, %p1866_p10 }
 0x417   : > { %1876 = shalt.err (!%p1873_p12)
}
 0x418   : > { %s2014_s18 = smov 128   ;;  %s2015_s20 = smov 256  }
 0x419   : > { %s2016_s19 = smov 8   ;;  %s1316_s5 = sshll.u32 %s2367_s30, 4  ;;  %s2519_s5 = int_to_ptr.vmem [resolvable:$true] %s1316_s5 }
 0x41a   : > { %1639 = dma.vmem_to_hbm [thread:$0]  (%p2604_p3), %s2485_s25, 1024, %s2482_s28, %s1283_s27, %s2014_s18, %s2015_s20, %s2016_s19  }
 0x41b   : > { %s2517_s23 = scalar_lea.hbm %s2571_s8, %s1529_s26  ;;  %s1288_s28 = scalar_lea.sflag [#allocation12], %s2209_s17 }
 0x41c   : > { %s1877_s25 = scalar_lea.vmem %s2519_s5, 128  ;;  %s2017_s27 = smov [#allocation11]  }
 0x41d   : > { %p1878_p13 = scmp.ne.s32.totalorder %s2519_s5, %s1877_s25  ;;  %s1881_s13 = sshll.u32 %s2017_s27, 4  ;;  %s1882_s13 = int_to_ptr.vmem [resolvable:$false] %s1881_s13 }
 0x41e   : > { %s1883_s2 = scalar_lea.vmem %s1882_s13, 256  ;;  %p1884_p6 = scmp.lt.s32.totalorder %s2519_s5, %s1882_s13 }
 0x41f   : > { %p1879_p0 = pnand %p1878_p13, %p2604_p3  ;;  %p1885_p9 = scmp.lt.s32.totalorder %s1883_s2, %s1877_s25 }
 0x421   : > { %p1880_p1 = pneg %p1879_p0  ;;  %p1886_p5 = por %p1885_p9, %p1884_p6 }
 0x423   : > { %p1887_p10 = pnand %p1886_p5, %p1880_p1 }
 0x498   : > { %v1277_v50 = vpop.xlane.xlu0 %1276 }
 0x499   : > { %v1278_v51 = vmax.f32 %v1277_v50, 1e-12 }
 0x49b   : > { %1777 = vrsqrt.f32 %v1278_v51 }
 0x4a5   : > { %v1778_v52 = vpop.eup %1777 }
 0x4a6   : > { %v1280_v53 = vmul.f32 %v1778_v52, %v1273_v49 }
 0x4a8   : > { %1281 = vst.msk [vmem:[%s2367_s30] sm:$0xff] %vm378_vm0, %v1280_v53 }
 0x4a9   : > { %1890 = shalt.err (!%p1887_p10)
}
 0x4aa   : > { %s1891_s17 = scalar_lea.hbm %s2517_s23, 128  ;;  %s1895_s24 = scalar_lea.hbm %s2571_s8, 256 }
 0x4ab   : > { %p1892_p2 = scmp.ne.s32.totalorder %s2517_s23, %s1891_s17  ;;  %p1896_p11 = scmp.lt.u32.totalorder %s2517_s23, %s2571_s8 }
 0x4ac   : > { %p1897_p8 = scmp.lt.u32.totalorder %s1895_s24, %s1891_s17  ;;  %p1899_p13 = scmp.lt.u32.totalorder %s1891_s17, %s2517_s23 }
 0x4ad   : > { %p1893_p4 = pnand %p1892_p2, %p2604_p3 }
 0x4ae   : > { %p1898_p12 = por %p1897_p8, %p1896_p11 }
 0x4af   : > { %p1894_p7 = pneg %p1893_p4 }
 0x4b0   : > { %p1900_p0 = por %p1899_p13, %p1898_p12 }
 0x4b2   : > { %p1901_p1 = pnand %p1900_p0, %p1894_p7 }
 0x4b4   : > { %1904 = shalt.err (!%p1901_p1)
}
 0x4b5   : > { %1640 = dma.vmem_to_hbm [thread:$0]  (%p2604_p3), %s2519_s5, 128, %s2517_s23, %s1288_s28  }
 0x4b6 PF: > { %s1328_s18 = sand.u32 1, %s1961_s0   ;;  %p2605_p6 = scmp.ne.s32.totalorder %s2585_s22, 0 }
 0x4b7   : > { %p2606_p9 = scmp.ge.s32.totalorder %s1973_s12, 2  ;;  %s1329_s20 = scalar_lea.sflag [#allocation7], %s1328_s18 }
 0x4b9   : > { %p1652_p5 = pnand %p2606_p9, %p2605_p6 }
 0x4bb   : > { %1952 = dma.done.wait (!%p1652_p5), %s1329_s20, 1024  }
 0x4bc   : > { %1954 = vsyncadd (!%p1652_p5), %s1329_s20, 4294966272  ;;  %s1338_s19 = scalar_lea.sflag [#allocation12], %s1328_s18 }
 0x4bd   : > { %1956 = dma.done.wait (!%p1652_p5), %s1338_s19, 128  }
 0x4be   : > { %1958 = vsyncadd (!%p1652_p5), %s1338_s19, 4294967168  ;;  %s2607_s21 = sld [smem:[#allocation18_spill]]  ;;  %p32_p3 = scmp.ge.s32.totalorder %s2091_s15, 4  }
 0x4bf   : > { %s2608_s0 = smov %s1965_s10  ;;  %s2609_s10 = smov %s1969_s11 }
 0x4c0   : > { %s2611_s12 = smov %s2091_s15  ;;  %34 = sbr.rel (!%p32_p3) target bundleno = 24 (0x18), region = 154 }
 0x4c4   : > { %s2610_s11 = smov %s2607_s21 }
 0x4c7   :  { %1343 = vsyncpa [#allocation6], 1 }
 0x4c8   :  { %1345 = vsyncpa [#allocation6 + $0x1], 1 }
 0x4c9   :  { %1346 = vsyncpa [#allocation9], 1 }
 0x4ca   :  { %1347 = vsyncpa [#allocation7], 1 }
 0x4cb   :  { %1349 = vsyncpa [#allocation7 + $0x1], 1 }
 0x4cc   :  { %1350 = vsyncpa [#allocation12], 1 }
 0x4cd   :  { %1352 = vsyncpa [#allocation12 + $0x1], 1 }

</bundles_post_ra>
